<compile_context>
chip_gen: v5e
topology: v5e:2x2
jax: 0.10.0
libtpu: 0.0.40
codegen_flags: <defaults>
</compile_context>

<pallas_src>
import math
import numpy as np
import jax
import jax.numpy as jnp
from jax import lax
from jax.experimental import pallas as pl
from jax.experimental.pallas import tpu as pltpu


def _round_up(x, m):
    return ((x + m - 1) // m) * m


def make_rnn_kernel(n_layers, seq_len):
    """Single-invocation kernel: unrolled in-kernel time loop + fc projection.

    Ref layout (all VMEM, padded):
      refs[0]                      x        (S, Bp, Ip)
      refs[1 .. L]                 W_l      ((Ip|Hp)+Hp, Hp)  packed [Wih^T; Whh^T]
      refs[1+L .. 2L]              b_l      (Bp, Hp)          bih+bhh, pre-broadcast
      refs[1+2L]                   fcW      (L*Hp, Op)
      refs[2+2L]                   fcb      (Bp, Op)
      refs[3+2L]                   y        (Bp, Op)          output
    """

    def kernel(*refs):
        x_ref = refs[0]
        w_refs = refs[1:1 + n_layers]
        b_refs = refs[1 + n_layers:1 + 2 * n_layers]
        fcw_ref = refs[1 + 2 * n_layers]
        fcb_ref = refs[2 + 2 * n_layers]
        y_ref = refs[3 + 2 * n_layers]

        # Time-invariant operands: load once, outside the recurrence loop.
        ws = [w_refs[l][...] for l in range(n_layers)]
        bs = [b_refs[l][...] for l in range(n_layers)]

        bp = x_ref.shape[1]          # padded batch (sublane multiple)
        hp = ws[0].shape[1]          # padded hidden (lane multiple)

        def step(t, hs):
            inp = x_ref[t]                                   # (Bp, Ip)
            new_hs = []
            for l in range(n_layers):
                zin = jnp.concatenate([inp, hs[l]], axis=-1)  # (Bp, Ip+Hp)/(Bp, 2Hp)
                h_new = jnp.tanh(
                    jnp.dot(zin, ws[l], preferred_element_type=jnp.float32)
                    + bs[l])
                new_hs.append(h_new)
                inp = h_new                                  # feed next stacked layer
            return tuple(new_hs)

        h0 = tuple(jnp.zeros((bp, hp), jnp.float32) for _ in range(n_layers))
        hs = lax.fori_loop(0, seq_len, step, h0, unroll=True)

        # rnn_h.permute(1,0,2).view(-1, L*H): per batch row, concat layer0..layerL-1.
        rnn_last = jnp.concatenate(list(hs), axis=-1)        # (Bp, L*Hp)
        y_ref[...] = (jnp.dot(rnn_last, fcw_ref[...],
                              preferred_element_type=jnp.float32)
                      + fcb_ref[...]).astype(y_ref.dtype)

    return kernel


def rnn_nnet_forward(x, params, *, n_layers, hidden_size, output_size):
    """Pallas forward pass.  x: (batch, input_size, seq_len) -> (batch, 1, output_size)."""
    B, I, S = x.shape
    H, L, O = hidden_size, n_layers, output_size

    Bp = _round_up(max(B, 1), 8)      # sublanes
    Ip = _round_up(max(I, 1), 128)    # lanes
    Hp = _round_up(max(H, 1), 128)
    Op = _round_up(max(O, 1), 128)

    # x.permute(2,0,1) -> time-major, zero-padded to full tiles.
    xs = jnp.transpose(x, (2, 0, 1)).astype(jnp.float32)     # (S, B, I)
    xs = jnp.pad(xs, ((0, 0), (0, Bp - B), (0, Ip - I)))

    # Pack [Wih^T ; Whh^T] per layer (zero-padded), pre-sum + broadcast biases.
    packed_w, packed_b = [], []
    for l in range(L):
        in_l = I if l == 0 else H
        in_p = Ip if l == 0 else Hp
        w = jnp.zeros((in_p + Hp, Hp), jnp.float32)
        w = w.at[:in_l, :H].set(params["wih"][l].T.astype(jnp.float32))
        w = w.at[in_p:in_p + H, :H].set(params["whh"][l].T.astype(jnp.float32))
        packed_w.append(w)
        b = jnp.zeros((Bp, Hp), jnp.float32)
        b = b.at[:, :H].set((params["bih"][l] + params["bhh"][l]).astype(jnp.float32))
        packed_b.append(b)

    # fc_affine, rearranged to the padded layer-concat layout.
    fcw = jnp.zeros((L * Hp, Op), jnp.float32)
    for l in range(L):
        fcw = fcw.at[l * Hp:l * Hp + H, :O].set(
            params["fcw"][:, l * H:(l + 1) * H].T.astype(jnp.float32))
    fcb = jnp.zeros((Bp, Op), jnp.float32)
    fcb = fcb.at[:, :O].set(params["fcb"].astype(jnp.float32))

    inputs = [xs] + packed_w + packed_b + [fcw, fcb]
    vmem = pl.BlockSpec(memory_space=pltpu.MemorySpace.VMEM)

    y_pad = pl.pallas_call(
        make_rnn_kernel(L, S),
        out_shape=jax.ShapeDtypeStruct((Bp, Op), jnp.float32),
        in_specs=[vmem] * len(inputs),
        out_specs=vmem,
        compiler_params=pltpu.CompilerParams(
            vmem_limit_bytes=16 * 1024 * 1024),   # total residency < 1 MiB; modest limit
    )(*inputs)

    return y_pad[:B, :O][:, None, :]              # (B, 1, O) like the module


def init_params(key, input_size, hidden_size, output_size, n_layers):
    """Deterministic init mimicking PyTorch's U(-1/sqrt(H), 1/sqrt(H))."""
    H, L = hidden_size, n_layers
    bound = 1.0 / math.sqrt(H)
    params = {"wih": [], "whh": [], "bih": [], "bhh": []}
    for l in range(L):
        in_l = input_size if l == 0 else H
        key, k1, k2, k3, k4 = jax.random.split(key, 5)
        params["wih"].append(jax.random.uniform(k1, (H, in_l), jnp.float32, -bound, bound))
        params["whh"].append(jax.random.uniform(k2, (H, H), jnp.float32, -bound, bound))
        params["bih"].append(jax.random.uniform(k3, (H,), jnp.float32, -bound, bound))
        params["bhh"].append(jax.random.uniform(k4, (H,), jnp.float32, -bound, bound))
    fan_in = L * H
    fc_bound = 1.0 / math.sqrt(fan_in)
    key, k1, k2 = jax.random.split(key, 3)
    params["fcw"] = jax.random.uniform(k1, (output_size, fan_in), jnp.float32, -fc_bound, fc_bound)
    params["fcb"] = jax.random.uniform(k2, (output_size,), jnp.float32, -fc_bound, fc_bound)
    return params


def rnn_nnet_reference(x, params, *, n_layers, hidden_size, output_size):
    """Pure-JAX reference of the same forward pass (for correctness check)."""
    B, I, S = x.shape
    xs = jnp.transpose(x, (2, 0, 1)).astype(jnp.float32)
    hs = [jnp.zeros((B, hidden_size), jnp.float32) for _ in range(n_layers)]
    for t in range(S):
        inp = xs[t]
        for l in range(n_layers):
            hs[l] = jnp.tanh(inp @ params["wih"][l].T + params["bih"][l]
                             + hs[l] @ params["whh"][l].T + params["bhh"][l])
            inp = hs[l]
    rnn_last = jnp.concatenate(hs, axis=-1)
    y = rnn_last @ params["fcw"].T + params["fcb"]
    return y[:, None, :]


if __name__ == "__main__":
    # Shapes implied by the module's forward:
    # x: (batch=2, input_size=4, seq_len=8), hidden=32, n_layers=2, output=4
    batch, input_size, seq_len = 2, 4, 8
    hidden_size, n_layers, output_size = 32, 2, 4

    key = jax.random.PRNGKey(0)
    key, kx = jax.random.split(key)
    x = jax.random.normal(kx, (batch, input_size, seq_len), jnp.float32)
    params = init_params(key, input_size, hidden_size, output_size, n_layers)

    forward = jax.jit(rnn_nnet_forward,
                      static_argnames=("n_layers", "hidden_size", "output_size"))
    y = forward(x, params, n_layers=n_layers,
                hidden_size=hidden_size, output_size=output_size)
    y = jax.block_until_ready(y)

    y_ref = rnn_nnet_reference(x, params, n_layers=n_layers,
                               hidden_size=hidden_size, output_size=output_size)
    assert y.shape == (batch, 1, output_size)
    np.testing.assert_allclose(np.asarray(y), np.asarray(y_ref), rtol=1e-5, atol=1e-5)

    print("KERNEL_OK")
</pallas_src>

<mosaic_0001>
module attributes {stable_mosaic.version = 11 : i64} {
  func.func @kernel(%arg0: memref<8x8x128xf32, #tpu.memory_space<vmem>>, %arg1: memref<256x128xf32, #tpu.memory_space<vmem>>, %arg2: memref<256x128xf32, #tpu.memory_space<vmem>>, %arg3: memref<8x128xf32, #tpu.memory_space<vmem>>, %arg4: memref<8x128xf32, #tpu.memory_space<vmem>>, %arg5: memref<256x128xf32, #tpu.memory_space<vmem>>, %arg6: memref<8x128xf32, #tpu.memory_space<vmem>>, %arg7: memref<8x128xf32, #tpu.memory_space<vmem>>) attributes {dimension_semantics = [], scalar_prefetch = 0 : i64, scratch_operands = 0 : i64, tpu.core_type = #tpu.core_type<tc>} {
    %c0 = arith.constant 0 : index
    %c0_0 = arith.constant 0 : index
    %0 = vector.load %arg1[%c0, %c0_0] : memref<256x128xf32, #tpu.memory_space<vmem>>, vector<256x128xf32>
    %c0_1 = arith.constant 0 : index
    %c0_2 = arith.constant 0 : index
    %1 = vector.load %arg2[%c0_1, %c0_2] : memref<256x128xf32, #tpu.memory_space<vmem>>, vector<256x128xf32>
    %c0_3 = arith.constant 0 : index
    %c0_4 = arith.constant 0 : index
    %2 = vector.load %arg3[%c0_3, %c0_4] : memref<8x128xf32, #tpu.memory_space<vmem>>, vector<8x128xf32>
    %c0_5 = arith.constant 0 : index
    %c0_6 = arith.constant 0 : index
    %3 = vector.load %arg4[%c0_5, %c0_6] : memref<8x128xf32, #tpu.memory_space<vmem>>, vector<8x128xf32>
    %cst = arith.constant 0.000000e+00 : f32
    %4 = vector.broadcast %cst : f32 to vector<8x128xf32>
    %cst_7 = arith.constant 0.000000e+00 : f32
    %5 = vector.broadcast %cst_7 : f32 to vector<8x128xf32>
    %c0_i32 = arith.constant 0 : i32
    %6 = arith.index_cast %c0_i32 : i32 to index
    %c0_8 = arith.constant 0 : index
    %c0_9 = arith.constant 0 : index
    %7 = vector.load %arg0[%6, %c0_8, %c0_9] : memref<8x8x128xf32, #tpu.memory_space<vmem>>, vector<1x8x128xf32>
    %8 = vector.shape_cast %7 : vector<1x8x128xf32> to vector<8x128xf32>
    %9 = tpu.concatenate %8, %4 in 1 : vector<8x128xf32>, vector<8x128xf32> -> vector<8x256xf32>
    %cst_10 = arith.constant dense<0.000000e+00> : vector<8x128xf32>
    %10 = tpu.matmul %9, %0, %cst_10 {dimension_numbers = #tpu.dot_dimension_numbers<[1], [0], [0], [1], [0, 0, 1, 1], [], []>} : vector<8x256xf32>, vector<256x128xf32>, vector<8x128xf32> -> vector<8x128xf32>
    %11 = arith.addf %10, %2 : vector<8x128xf32>
    %12 = math.tanh %11 : vector<8x128xf32>
    %13 = tpu.concatenate %12, %5 in 1 : vector<8x128xf32>, vector<8x128xf32> -> vector<8x256xf32>
    %cst_11 = arith.constant dense<0.000000e+00> : vector<8x128xf32>
    %14 = tpu.matmul %13, %1, %cst_11 {dimension_numbers = #tpu.dot_dimension_numbers<[1], [0], [0], [1], [0, 0, 1, 1], [], []>} : vector<8x256xf32>, vector<256x128xf32>, vector<8x128xf32> -> vector<8x128xf32>
    %15 = arith.addf %14, %3 : vector<8x128xf32>
    %16 = math.tanh %15 : vector<8x128xf32>
    %c1_i32 = arith.constant 1 : i32
    %17 = arith.index_cast %c1_i32 : i32 to index
    %c0_12 = arith.constant 0 : index
    %c0_13 = arith.constant 0 : index
    %18 = vector.load %arg0[%17, %c0_12, %c0_13] : memref<8x8x128xf32, #tpu.memory_space<vmem>>, vector<1x8x128xf32>
    %19 = vector.shape_cast %18 : vector<1x8x128xf32> to vector<8x128xf32>
    %20 = tpu.concatenate %19, %12 in 1 : vector<8x128xf32>, vector<8x128xf32> -> vector<8x256xf32>
    %cst_14 = arith.constant dense<0.000000e+00> : vector<8x128xf32>
    %21 = tpu.matmul %20, %0, %cst_14 {dimension_numbers = #tpu.dot_dimension_numbers<[1], [0], [0], [1], [0, 0, 1, 1], [], []>} : vector<8x256xf32>, vector<256x128xf32>, vector<8x128xf32> -> vector<8x128xf32>
    %22 = arith.addf %21, %2 : vector<8x128xf32>
    %23 = math.tanh %22 : vector<8x128xf32>
    %24 = tpu.concatenate %23, %16 in 1 : vector<8x128xf32>, vector<8x128xf32> -> vector<8x256xf32>
    %cst_15 = arith.constant dense<0.000000e+00> : vector<8x128xf32>
    %25 = tpu.matmul %24, %1, %cst_15 {dimension_numbers = #tpu.dot_dimension_numbers<[1], [0], [0], [1], [0, 0, 1, 1], [], []>} : vector<8x256xf32>, vector<256x128xf32>, vector<8x128xf32> -> vector<8x128xf32>
    %26 = arith.addf %25, %3 : vector<8x128xf32>
    %27 = math.tanh %26 : vector<8x128xf32>
    %c2_i32 = arith.constant 2 : i32
    %28 = arith.index_cast %c2_i32 : i32 to index
    %c0_16 = arith.constant 0 : index
    %c0_17 = arith.constant 0 : index
    %29 = vector.load %arg0[%28, %c0_16, %c0_17] : memref<8x8x128xf32, #tpu.memory_space<vmem>>, vector<1x8x128xf32>
    %30 = vector.shape_cast %29 : vector<1x8x128xf32> to vector<8x128xf32>
    %31 = tpu.concatenate %30, %23 in 1 : vector<8x128xf32>, vector<8x128xf32> -> vector<8x256xf32>
    %cst_18 = arith.constant dense<0.000000e+00> : vector<8x128xf32>
    %32 = tpu.matmul %31, %0, %cst_18 {dimension_numbers = #tpu.dot_dimension_numbers<[1], [0], [0], [1], [0, 0, 1, 1], [], []>} : vector<8x256xf32>, vector<256x128xf32>, vector<8x128xf32> -> vector<8x128xf32>
    %33 = arith.addf %32, %2 : vector<8x128xf32>
    %34 = math.tanh %33 : vector<8x128xf32>
    %35 = tpu.concatenate %34, %27 in 1 : vector<8x128xf32>, vector<8x128xf32> -> vector<8x256xf32>
    %cst_19 = arith.constant dense<0.000000e+00> : vector<8x128xf32>
    %36 = tpu.matmul %35, %1, %cst_19 {dimension_numbers = #tpu.dot_dimension_numbers<[1], [0], [0], [1], [0, 0, 1, 1], [], []>} : vector<8x256xf32>, vector<256x128xf32>, vector<8x128xf32> -> vector<8x128xf32>
    %37 = arith.addf %36, %3 : vector<8x128xf32>
    %38 = math.tanh %37 : vector<8x128xf32>
    %c3_i32 = arith.constant 3 : i32
    %39 = arith.index_cast %c3_i32 : i32 to index
    %c0_20 = arith.constant 0 : index
    %c0_21 = arith.constant 0 : index
    %40 = vector.load %arg0[%39, %c0_20, %c0_21] : memref<8x8x128xf32, #tpu.memory_space<vmem>>, vector<1x8x128xf32>
    %41 = vector.shape_cast %40 : vector<1x8x128xf32> to vector<8x128xf32>
    %42 = tpu.concatenate %41, %34 in 1 : vector<8x128xf32>, vector<8x128xf32> -> vector<8x256xf32>
    %cst_22 = arith.constant dense<0.000000e+00> : vector<8x128xf32>
    %43 = tpu.matmul %42, %0, %cst_22 {dimension_numbers = #tpu.dot_dimension_numbers<[1], [0], [0], [1], [0, 0, 1, 1], [], []>} : vector<8x256xf32>, vector<256x128xf32>, vector<8x128xf32> -> vector<8x128xf32>
    %44 = arith.addf %43, %2 : vector<8x128xf32>
    %45 = math.tanh %44 : vector<8x128xf32>
    %46 = tpu.concatenate %45, %38 in 1 : vector<8x128xf32>, vector<8x128xf32> -> vector<8x256xf32>
    %cst_23 = arith.constant dense<0.000000e+00> : vector<8x128xf32>
    %47 = tpu.matmul %46, %1, %cst_23 {dimension_numbers = #tpu.dot_dimension_numbers<[1], [0], [0], [1], [0, 0, 1, 1], [], []>} : vector<8x256xf32>, vector<256x128xf32>, vector<8x128xf32> -> vector<8x128xf32>
    %48 = arith.addf %47, %3 : vector<8x128xf32>
    %49 = math.tanh %48 : vector<8x128xf32>
    %c4_i32 = arith.constant 4 : i32
    %50 = arith.index_cast %c4_i32 : i32 to index
    %c0_24 = arith.constant 0 : index
    %c0_25 = arith.constant 0 : index
    %51 = vector.load %arg0[%50, %c0_24, %c0_25] : memref<8x8x128xf32, #tpu.memory_space<vmem>>, vector<1x8x128xf32>
    %52 = vector.shape_cast %51 : vector<1x8x128xf32> to vector<8x128xf32>
    %53 = tpu.concatenate %52, %45 in 1 : vector<8x128xf32>, vector<8x128xf32> -> vector<8x256xf32>
    %cst_26 = arith.constant dense<0.000000e+00> : vector<8x128xf32>
    %54 = tpu.matmul %53, %0, %cst_26 {dimension_numbers = #tpu.dot_dimension_numbers<[1], [0], [0], [1], [0, 0, 1, 1], [], []>} : vector<8x256xf32>, vector<256x128xf32>, vector<8x128xf32> -> vector<8x128xf32>
    %55 = arith.addf %54, %2 : vector<8x128xf32>
    %56 = math.tanh %55 : vector<8x128xf32>
    %57 = tpu.concatenate %56, %49 in 1 : vector<8x128xf32>, vector<8x128xf32> -> vector<8x256xf32>
    %cst_27 = arith.constant dense<0.000000e+00> : vector<8x128xf32>
    %58 = tpu.matmul %57, %1, %cst_27 {dimension_numbers = #tpu.dot_dimension_numbers<[1], [0], [0], [1], [0, 0, 1, 1], [], []>} : vector<8x256xf32>, vector<256x128xf32>, vector<8x128xf32> -> vector<8x128xf32>
    %59 = arith.addf %58, %3 : vector<8x128xf32>
    %60 = math.tanh %59 : vector<8x128xf32>
    %c5_i32 = arith.constant 5 : i32
    %61 = arith.index_cast %c5_i32 : i32 to index
    %c0_28 = arith.constant 0 : index
    %c0_29 = arith.constant 0 : index
    %62 = vector.load %arg0[%61, %c0_28, %c0_29] : memref<8x8x128xf32, #tpu.memory_space<vmem>>, vector<1x8x128xf32>
    %63 = vector.shape_cast %62 : vector<1x8x128xf32> to vector<8x128xf32>
    %64 = tpu.concatenate %63, %56 in 1 : vector<8x128xf32>, vector<8x128xf32> -> vector<8x256xf32>
    %cst_30 = arith.constant dense<0.000000e+00> : vector<8x128xf32>
    %65 = tpu.matmul %64, %0, %cst_30 {dimension_numbers = #tpu.dot_dimension_numbers<[1], [0], [0], [1], [0, 0, 1, 1], [], []>} : vector<8x256xf32>, vector<256x128xf32>, vector<8x128xf32> -> vector<8x128xf32>
    %66 = arith.addf %65, %2 : vector<8x128xf32>
    %67 = math.tanh %66 : vector<8x128xf32>
    %68 = tpu.concatenate %67, %60 in 1 : vector<8x128xf32>, vector<8x128xf32> -> vector<8x256xf32>
    %cst_31 = arith.constant dense<0.000000e+00> : vector<8x128xf32>
    %69 = tpu.matmul %68, %1, %cst_31 {dimension_numbers = #tpu.dot_dimension_numbers<[1], [0], [0], [1], [0, 0, 1, 1], [], []>} : vector<8x256xf32>, vector<256x128xf32>, vector<8x128xf32> -> vector<8x128xf32>
    %70 = arith.addf %69, %3 : vector<8x128xf32>
    %71 = math.tanh %70 : vector<8x128xf32>
    %c6_i32 = arith.constant 6 : i32
    %72 = arith.index_cast %c6_i32 : i32 to index
    %c0_32 = arith.constant 0 : index
    %c0_33 = arith.constant 0 : index
    %73 = vector.load %arg0[%72, %c0_32, %c0_33] : memref<8x8x128xf32, #tpu.memory_space<vmem>>, vector<1x8x128xf32>
    %74 = vector.shape_cast %73 : vector<1x8x128xf32> to vector<8x128xf32>
    %75 = tpu.concatenate %74, %67 in 1 : vector<8x128xf32>, vector<8x128xf32> -> vector<8x256xf32>
    %cst_34 = arith.constant dense<0.000000e+00> : vector<8x128xf32>
    %76 = tpu.matmul %75, %0, %cst_34 {dimension_numbers = #tpu.dot_dimension_numbers<[1], [0], [0], [1], [0, 0, 1, 1], [], []>} : vector<8x256xf32>, vector<256x128xf32>, vector<8x128xf32> -> vector<8x128xf32>
    %77 = arith.addf %76, %2 : vector<8x128xf32>
    %78 = math.tanh %77 : vector<8x128xf32>
    %79 = tpu.concatenate %78, %71 in 1 : vector<8x128xf32>, vector<8x128xf32> -> vector<8x256xf32>
    %cst_35 = arith.constant dense<0.000000e+00> : vector<8x128xf32>
    %80 = tpu.matmul %79, %1, %cst_35 {dimension_numbers = #tpu.dot_dimension_numbers<[1], [0], [0], [1], [0, 0, 1, 1], [], []>} : vector<8x256xf32>, vector<256x128xf32>, vector<8x128xf32> -> vector<8x128xf32>
    %81 = arith.addf %80, %3 : vector<8x128xf32>
    %82 = math.tanh %81 : vector<8x128xf32>
    %c7_i32 = arith.constant 7 : i32
    %83 = arith.index_cast %c7_i32 : i32 to index
    %c0_36 = arith.constant 0 : index
    %c0_37 = arith.constant 0 : index
    %84 = vector.load %arg0[%83, %c0_36, %c0_37] : memref<8x8x128xf32, #tpu.memory_space<vmem>>, vector<1x8x128xf32>
    %85 = vector.shape_cast %84 : vector<1x8x128xf32> to vector<8x128xf32>
    %86 = tpu.concatenate %85, %78 in 1 : vector<8x128xf32>, vector<8x128xf32> -> vector<8x256xf32>
    %cst_38 = arith.constant dense<0.000000e+00> : vector<8x128xf32>
    %87 = tpu.matmul %86, %0, %cst_38 {dimension_numbers = #tpu.dot_dimension_numbers<[1], [0], [0], [1], [0, 0, 1, 1], [], []>} : vector<8x256xf32>, vector<256x128xf32>, vector<8x128xf32> -> vector<8x128xf32>
    %88 = arith.addf %87, %2 : vector<8x128xf32>
    %89 = math.tanh %88 : vector<8x128xf32>
    %90 = tpu.concatenate %89, %82 in 1 : vector<8x128xf32>, vector<8x128xf32> -> vector<8x256xf32>
    %cst_39 = arith.constant dense<0.000000e+00> : vector<8x128xf32>
    %91 = tpu.matmul %90, %1, %cst_39 {dimension_numbers = #tpu.dot_dimension_numbers<[1], [0], [0], [1], [0, 0, 1, 1], [], []>} : vector<8x256xf32>, vector<256x128xf32>, vector<8x128xf32> -> vector<8x128xf32>
    %92 = arith.addf %91, %3 : vector<8x128xf32>
    %93 = math.tanh %92 : vector<8x128xf32>
    %c8_i32 = arith.constant 8 : i32
    %94 = tpu.concatenate %89, %93 in 1 : vector<8x128xf32>, vector<8x128xf32> -> vector<8x256xf32>
    %c0_40 = arith.constant 0 : index
    %c0_41 = arith.constant 0 : index
    %95 = vector.load %arg5[%c0_40, %c0_41] : memref<256x128xf32, #tpu.memory_space<vmem>>, vector<256x128xf32>
    %cst_42 = arith.constant dense<0.000000e+00> : vector<8x128xf32>
    %96 = tpu.matmul %94, %95, %cst_42 {dimension_numbers = #tpu.dot_dimension_numbers<[1], [0], [0], [1], [0, 0, 1, 1], [], []>} : vector<8x256xf32>, vector<256x128xf32>, vector<8x128xf32> -> vector<8x128xf32>
    %c0_43 = arith.constant 0 : index
    %c0_44 = arith.constant 0 : index
    %97 = vector.load %arg6[%c0_43, %c0_44] : memref<8x128xf32, #tpu.memory_space<vmem>>, vector<8x128xf32>
    %98 = arith.addf %96, %97 : vector<8x128xf32>
    %c0_45 = arith.constant 0 : index
    %c0_46 = arith.constant 0 : index
    %99 = vector.load %arg7[%c0_45, %c0_46] : memref<8x128xf32, #tpu.memory_space<vmem>>, vector<8x128xf32>
    tpu.vector_store %arg7[%c0_45, %c0_46], %98 {strides = array<i32>} : memref<8x128xf32, #tpu.memory_space<vmem>>, vector<8x128xf32>,
    return
  }
}

</mosaic_0001>

<bundles_post_ra>
// kernel: rnn_nnet_forward.1
= control target key start
LH: loop header
LB: loop body
LE: loop exit
PB: predicated region body
PF: predicated region fallthrough
CT: control target
= control target key end

     0   :  { %v2073_v52 = vmov 0.0   ;;  %s2065_s1 = inlined_call_operand.vmem [shape: f32[256,128], index: 1, kind: input, shape index: {}]   ;;  %s2066_s2 = inlined_call_operand.vmem [shape: f32[256,128], index: 2, kind: input, shape index: {}]   ;;  %s2067_s0 = inlined_call_operand.vmem [shape: f32[8,8,128], index: 0, kind: input, shape index: {}]   ;;  %s2068_s3 = inlined_call_operand.vmem [shape: f32[8,128], index: 3, kind: input, shape index: {}]   ;;  %s2069_s4 = inlined_call_operand.vmem [shape: f32[8,128], index: 4, kind: input, shape index: {}]   ;;  %s2070_s5 = inlined_call_operand.vmem [shape: f32[256,128], index: 5, kind: input, shape index: {}]   ;;  %s2071_s6 = inlined_call_operand.vmem [shape: f32[8,128], index: 6, kind: input, shape index: {}]   ;;  %s2072_s7 = inlined_call_operand.vmem [shape: f32[8,128], index: 7, kind: output, shape index: {}]  }
   0x1   :  { %v970_v0 = vld [vmem:[%s2065_s1 + $0x78] sm:$0xff]  ;;  %v975_v1 = vld [vmem:[%s2065_s1 + $0x70] sm:$0xff]  ;;  %v992_v4 = vld [vmem:[%s2065_s1 + $0x68] sm:$0xff] }
   0x2   :  { %2104 = vst [vmem:[#allocation2_spill] sm:$0xff] %v970_v0  ;;  %v980_v2 = vld [vmem:[%s2065_s1 + $0xf8] sm:$0xff]  ;;  %93 = vmatpush.msra.mxu0 %v970_v0  ;;  %v987_v3 = vld [vmem:[%s2065_s1 + $0xf0] sm:$0xff]  ;;  %v997_v5 = vld [vmem:[%s2065_s1 + $0xe8] sm:$0xff] }
   0x3   :  { %2105 = vst [vmem:[#allocation3_spill] sm:$0xff] %v975_v1  ;;  %113 = vmatpush.msra.mxu1 %v980_v2  ;;  %v1004_v6 = vld [vmem:[%s2065_s1 + $0x60] sm:$0xff]  ;;  %v1016_v8 = vld [vmem:[%s2065_s1 + $0x58] sm:$0xff]  ;;  %v1028_v10 = vld [vmem:[%s2065_s1 + $0x50] sm:$0xff] }
   0x4   :  { %2106 = vst [vmem:[#allocation4_spill] sm:$0xff] %v992_v4  ;;  %94 = vmatpush.msra.mxu0 %v975_v1  ;;  %v1009_v7 = vld [vmem:[%s2065_s1 + $0xe0] sm:$0xff]  ;;  %v1021_v9 = vld [vmem:[%s2065_s1 + $0xd8] sm:$0xff]  ;;  %v1033_v11 = vld [vmem:[%s2065_s1 + $0xd0] sm:$0xff] }
   0x5   :  { %114 = vmatpush.msra.mxu1 %v987_v3  ;;  %2107 = vst [vmem:[#allocation5_spill] sm:$0xff] %v1004_v6  ;;  %v1040_v12 = vld [vmem:[%s2065_s1 + $0x48] sm:$0xff]  ;;  %v1052_v14 = vld [vmem:[%s2066_s2 + $0x78] sm:$0xff]  ;;  %v1057_v15 = vld [vmem:[%s2066_s2 + $0x70] sm:$0xff] }
   0x6   :  { %95 = vmatpush.msra.mxu0 %v992_v4  ;;  %2108 = vst [vmem:[#allocation6_spill] sm:$0xff] %v1040_v12  ;;  %v1045_v13 = vld [vmem:[%s2065_s1 + $0xc8] sm:$0xff]  ;;  %v1062_v16 = vld [vmem:[%s2066_s2 + $0xf8] sm:$0xff]  ;;  %v1067_v17 = vld [vmem:[%s2065_s1 + $0x40] sm:$0xff]  ;;  %134 = vmatpush.msra.mxu2 %v1052_v14 }
   0x7   :  { %115 = vmatpush.msra.mxu1 %v997_v5  ;;  %2109 = vst [vmem:[#allocation7_spill] sm:$0xff] %v1067_v17  ;;  %v1072_v18 = vld [vmem:[%s2065_s1 + $0xc0] sm:$0xff]  ;;  %154 = vmatpush.msra.mxu3 %v1062_v16  ;;  %v1079_v19 = vld [vmem:[%s2066_s2 + $0xf0] sm:$0xff]  ;;  %v1086_v20 = vld [vmem:[%s2066_s2 + $0x68] sm:$0xff] }
   0x8   :  { %96 = vmatpush.msra.mxu0 %v1004_v6  ;;  %v1091_v21 = vld [vmem:[%s2066_s2 + $0xe8] sm:$0xff]  ;;  %v1096_v22 = vld [vmem:[%s2065_s1 + $0x38] sm:$0xff]  ;;  %135 = vmatpush.msra.mxu2 %v1057_v15  ;;  %v1110_v24 = vld [vmem:[%s2066_s2 + $0x60] sm:$0xff] }
   0x9   :  { %116 = vmatpush.msra.mxu1 %v1009_v7  ;;  %2110 = vst [vmem:[#allocation8_spill] sm:$0xff] %v1096_v22  ;;  %v1101_v23 = vld [vmem:[%s2065_s1 + $0xb8] sm:$0xff]  ;;  %155 = vmatpush.msra.mxu3 %v1079_v19  ;;  %v1115_v25 = vld [vmem:[%s2066_s2 + $0xe0] sm:$0xff]  ;;  %v1120_v26 = vld [vmem:[%s2065_s1 + $0x30] sm:$0xff] }
   0xa   :  { %97 = vmatpush.msra.mxu0 %v1016_v8  ;;  %2111 = vst [vmem:[#allocation9_spill] sm:$0xff] %v1120_v26  ;;  %v1125_v27 = vld [vmem:[%s2065_s1 + $0xb0] sm:$0xff]  ;;  %136 = vmatpush.msra.mxu2 %v1086_v20  ;;  %v1134_v28 = vld [vmem:[%s2066_s2 + $0x58] sm:$0xff]  ;;  %v1144_v30 = vld [vmem:[%s2065_s1 + $0x28] sm:$0xff] }
   0xb   :  { %117 = vmatpush.msra.mxu1 %v1021_v9  ;;  %156 = vmatpush.msra.mxu3 %v1091_v21  ;;  %v1139_v29 = vld [vmem:[%s2066_s2 + $0xd8] sm:$0xff]  ;;  %2112 = vst [vmem:[#allocation10_spill] sm:$0xff] %v1144_v30  ;;  %v1149_v31 = vld [vmem:[%s2065_s1 + $0xa8] sm:$0xff]  ;;  %v1158_v32 = vld [vmem:[%s2066_s2 + $0x50] sm:$0xff] }
   0xc   :  { %98 = vmatpush.msra.mxu0 %v1028_v10  ;;  %137 = vmatpush.msra.mxu2 %v1110_v24  ;;  %v1163_v33 = vld [vmem:[%s2066_s2 + $0xd0] sm:$0xff]  ;;  %v1168_v34 = vld [vmem:[%s2065_s1 + $0x20] sm:$0xff]  ;;  %v1182_v36 = vld [vmem:[%s2066_s2 + $0x48] sm:$0xff] }
   0xd   :  { %118 = vmatpush.msra.mxu1 %v1033_v11  ;;  %157 = vmatpush.msra.mxu3 %v1115_v25  ;;  %2113 = vst [vmem:[#allocation11_spill] sm:$0xff] %v1168_v34  ;;  %v1173_v35 = vld [vmem:[%s2065_s1 + $0xa0] sm:$0xff]  ;;  %v1187_v37 = vld [vmem:[%s2066_s2 + $0xc8] sm:$0xff]  ;;  %v1192_v38 = vld [vmem:[%s2065_s1 + $0x18] sm:$0xff] }
   0xe   :  { %99 = vmatpush.msra.mxu0 %v1040_v12  ;;  %138 = vmatpush.msra.mxu2 %v1134_v28  ;;  %v1197_v39 = vld [vmem:[%s2065_s1 + $0x98] sm:$0xff]  ;;  %v1206_v40 = vld [vmem:[%s2066_s2 + $0x40] sm:$0xff]  ;;  %v1216_v42 = vld [vmem:[%s2065_s1 + $0x10] sm:$0xff] }
   0xf   :  { %119 = vmatpush.msra.mxu1 %v1045_v13  ;;  %158 = vmatpush.msra.mxu3 %v1139_v29  ;;  %v1211_v41 = vld [vmem:[%s2066_s2 + $0xc0] sm:$0xff]  ;;  %v1221_v43 = vld [vmem:[%s2065_s1 + $0x90] sm:$0xff]  ;;  %v1230_v44 = vld [vmem:[%s2066_s2 + $0x38] sm:$0xff] }
  0x10   :  { %100 = vmatpush.msra.mxu0 %v1067_v17  ;;  %139 = vmatpush.msra.mxu2 %v1158_v32  ;;  %v1235_v45 = vld [vmem:[%s2066_s2 + $0xb8] sm:$0xff]  ;;  %v1240_v46 = vld [vmem:[%s2065_s1 + $0x8] sm:$0xff]  ;;  %v1254_v48 = vld [vmem:[%s2066_s2 + $0x30] sm:$0xff] }
  0x11   :  { %120 = vmatpush.msra.mxu1 %v1072_v18  ;;  %159 = vmatpush.msra.mxu3 %v1163_v33  ;;  %v1245_v47 = vld [vmem:[%s2065_s1 + $0x88] sm:$0xff]  ;;  %v1259_v49 = vld [vmem:[%s2065_s1] sm:$0xff]  ;;  %v1349_v54 = vld [vmem:[%s2066_s2 + $0xb0] sm:$0xff] }
  0x12   :  { %101 = vmatpush.msra.mxu0 %v1096_v22  ;;  %140 = vmatpush.msra.mxu2 %v1182_v36  ;;  %v1264_v50 = vld [vmem:[%s2065_s1 + $0x80] sm:$0xff]  ;;  %v1344_v53 = vld [vmem:[%s2066_s2 + $0x28] sm:$0xff]  ;;  %v1368_v57 = vld [vmem:[%s2066_s2 + $0x18] sm:$0xff] }
  0x13   :  { %121 = vmatpush.msra.mxu1 %v1101_v23  ;;  %160 = vmatpush.msra.mxu3 %v1187_v37  ;;  %2114 = vst [vmem:[#allocation12_spill] sm:$0xff] %v1264_v50  ;;  %v92_v51 = vld [vmem:[%s2067_s0] sm:$0xff]  ;;  %v1361_v56 = vld [vmem:[%s2066_s2 + $0xa8] sm:$0xff]  ;;  %v1380_v59 = vld [vmem:[%s2066_s2 + $0x10] sm:$0xff] }
  0x14   :  { %102 = vmatpush.msra.mxu0 %v1120_v26  ;;  %141 = vmatpush.msra.mxu2 %v1206_v40  ;;  %v1356_v55 = vld [vmem:[%s2066_s2 + $0x20] sm:$0xff]  ;;  %v1385_v60 = vld [vmem:[%s2066_s2 + $0x98] sm:$0xff]  ;;  %v1390_v61 = vld [vmem:[%s2066_s2 + $0x8] sm:$0xff] }
  0x15   :  { %122 = vmatpush.msra.mxu1 %v1125_v27  ;;  %161 = vmatpush.msra.mxu3 %v1211_v41  ;;  %v1373_v58 = vld [vmem:[%s2066_s2 + $0xa0] sm:$0xff]  ;;  %v1395_v62 = vld [vmem:[%s2066_s2 + $0x90] sm:$0xff]  ;;  %v841_v63 = vld [vmem:[%s2067_s0 + $0x8] sm:$0xff] }
  0x16   :  { %103 = vmatpush.msra.mxu0 %v1144_v30  ;;  %142 = vmatpush.msra.mxu2 %v1230_v44  ;;  %2115 = vst [vmem:[#allocation13_spill] sm:$0xff] %v1373_v58 }
  0x17   :  { %123 = vmatpush.msra.mxu1 %v1149_v31  ;;  %162 = vmatpush.msra.mxu3 %v1235_v45  ;;  %2116 = vst [vmem:[#allocation14_spill] sm:$0xff] %v1395_v62 }
  0x18   :  { %104 = vmatpush.msra.mxu0 %v1168_v34  ;;  %143 = vmatpush.msra.mxu2 %v1254_v48 }
  0x19   :  { %124 = vmatpush.msra.mxu1 %v1173_v35  ;;  %163 = vmatpush.msra.mxu3 %v1349_v54 }
  0x1a   :  { %105 = vmatpush.msra.mxu0 %v1192_v38  ;;  %144 = vmatpush.msra.mxu2 %v1344_v53 }
  0x1b   :  { %125 = vmatpush.msra.mxu1 %v1197_v39  ;;  %164 = vmatpush.msra.mxu3 %v1361_v56 }
  0x1c   :  { %106 = vmatpush.msra.mxu0 %v1216_v42  ;;  %145 = vmatpush.msra.mxu2 %v1356_v55 }
  0x1d   :  { %126 = vmatpush.msra.mxu1 %v1221_v43  ;;  %165 = vmatpush.msra.mxu3 %v1373_v58 }
  0x1e   :  { %107 = vmatpush.msra.mxu0 %v1240_v46  ;;  %146 = vmatpush.msra.mxu2 %v1368_v57 }
  0x1f   :  { %127 = vmatpush.msra.mxu1 %v1245_v47  ;;  %166 = vmatpush.msra.mxu3 %v1385_v60 }
  0x20   :  { %108 = vmatpush.msra.mxu0 %v1259_v49  ;;  %147 = vmatpush.msra.mxu2 %v1380_v59 }
  0x21   :  { %128 = vmatpush.msra.mxu1 %v1264_v50  ;;  %109 = vmatmul.f32.vlgmr.msra.gmra.mxu0 %v92_v51  ;;  %v1405_v51 = vld [vmem:[%s2066_s2] sm:$0xff] }
  0x22   :  { %129 = vmatmul.f32.vlgmr.msra.gmra.mxu1 %v2073_v52  ;;  %177 = vmatpush.msrb.mxu0 %v970_v0  ;;  %v1410_v52 = vld [vmem:[%s2066_s2 + $0x88] sm:$0xff] }
  0x23   :  { %197 = vmatpush.msrb.mxu1 %v980_v2  ;;  %2117 = vst [vmem:[#allocation15_spill] sm:$0xff] %v1410_v52  ;;  %148 = vmatpush.msra.mxu2 %v1390_v61 }
  0x24   :  { %178 = vmatpush.msrb.mxu0 %v975_v1  ;;  %167 = vmatpush.msra.mxu3 %v1395_v62 }
  0x25   :  { %198 = vmatpush.msrb.mxu1 %v987_v3  ;;  %149 = vmatpush.msra.mxu2 %v1405_v51 }
  0x26   :  { %179 = vmatpush.msrb.mxu0 %v992_v4  ;;  %168 = vmatpush.msra.mxu3 %v1410_v52 }
  0x27   :  { %199 = vmatpush.msrb.mxu1 %v997_v5  ;;  %218 = vmatpush.msrb.mxu2 %v1052_v14 }
  0x28   :  { %180 = vmatpush.msrb.mxu0 %v1004_v6 }
  0x29   :  { %200 = vmatpush.msrb.mxu1 %v1009_v7  ;;  %219 = vmatpush.msrb.mxu2 %v1057_v15 }
  0x2a   :  { %181 = vmatpush.msrb.mxu0 %v1016_v8 }
  0x2b   :  { %201 = vmatpush.msrb.mxu1 %v1021_v9  ;;  %220 = vmatpush.msrb.mxu2 %v1086_v20 }
  0x2c   :  { %182 = vmatpush.msrb.mxu0 %v1028_v10 }
  0x2d   :  { %202 = vmatpush.msrb.mxu1 %v1033_v11  ;;  %221 = vmatpush.msrb.mxu2 %v1110_v24 }
  0x2e   :  { %183 = vmatpush.msrb.mxu0 %v1040_v12 }
  0x2f   :  { %203 = vmatpush.msrb.mxu1 %v1045_v13  ;;  %222 = vmatpush.msrb.mxu2 %v1134_v28 }
  0x30   :  { %184 = vmatpush.msrb.mxu0 %v1067_v17 }
  0x31   :  { %204 = vmatpush.msrb.mxu1 %v1072_v18  ;;  %223 = vmatpush.msrb.mxu2 %v1158_v32 }
  0x32   :  { %185 = vmatpush.msrb.mxu0 %v1096_v22 }
  0x33   :  { %205 = vmatpush.msrb.mxu1 %v1101_v23  ;;  %224 = vmatpush.msrb.mxu2 %v1182_v36 }
  0x34   :  { %186 = vmatpush.msrb.mxu0 %v1120_v26 }
  0x35   :  { %206 = vmatpush.msrb.mxu1 %v1125_v27  ;;  %225 = vmatpush.msrb.mxu2 %v1206_v40 }
  0x36   :  { %187 = vmatpush.msrb.mxu0 %v1144_v30 }
  0x37   :  { %207 = vmatpush.msrb.mxu1 %v1149_v31  ;;  %226 = vmatpush.msrb.mxu2 %v1230_v44 }
  0x38   :  { %188 = vmatpush.msrb.mxu0 %v1168_v34 }
  0x39   :  { %208 = vmatpush.msrb.mxu1 %v1173_v35  ;;  %227 = vmatpush.msrb.mxu2 %v1254_v48 }
  0x3a   :  { %189 = vmatpush.msrb.mxu0 %v1192_v38 }
  0x3b   :  { %209 = vmatpush.msrb.mxu1 %v1197_v39  ;;  %228 = vmatpush.msrb.mxu2 %v1344_v53 }
  0x3c   :  { %190 = vmatpush.msrb.mxu0 %v1216_v42 }
  0x3d   :  { %210 = vmatpush.msrb.mxu1 %v1221_v43  ;;  %229 = vmatpush.msrb.mxu2 %v1356_v55 }
  0x3e   :  { %191 = vmatpush.msrb.mxu0 %v1240_v46 }
  0x3f   :  { %211 = vmatpush.msrb.mxu1 %v1245_v47  ;;  %230 = vmatpush.msrb.mxu2 %v1368_v57 }
  0x40   :  { %192 = vmatpush.msrb.mxu0 %v1259_v49 }
  0x41   :  { %212 = vmatpush.msrb.mxu1 %v1264_v50  ;;  %193 = vmatmul.f32.vlgmr.msrb.gmra.mxu0 %v841_v63  ;;  %v1420_v63 = vld [vmem:[%s2066_s2 + $0x80] sm:$0xff] }
  0x42   :  { %261 = vmatpush.msra.mxu0 %v970_v0  ;;  %2118 = vst [vmem:[#allocation16_spill] sm:$0xff] %v1420_v63  ;;  %169 = vmatpush.msra.mxu3 %v1420_v63 }
  0x43   :  { %281 = vmatpush.msra.mxu1 %v980_v2  ;;  %231 = vmatpush.msrb.mxu2 %v1380_v59 }
  0x44   :  { %262 = vmatpush.msra.mxu0 %v975_v1  ;;  %238 = vmatpush.msrb.mxu3 %v1062_v16 }
  0x45   :  { %282 = vmatpush.msra.mxu1 %v987_v3  ;;  %232 = vmatpush.msrb.mxu2 %v1390_v61 }
  0x46   :  { %263 = vmatpush.msra.mxu0 %v992_v4  ;;  %239 = vmatpush.msrb.mxu3 %v1079_v19 }
  0x47   :  { %283 = vmatpush.msra.mxu1 %v997_v5  ;;  %233 = vmatpush.msrb.mxu2 %v1405_v51 }
  0x48   :  { %264 = vmatpush.msra.mxu0 %v1004_v6  ;;  %240 = vmatpush.msrb.mxu3 %v1091_v21 }
  0x49   :  { %284 = vmatpush.msra.mxu1 %v1009_v7 }
  0x4a   :  { %265 = vmatpush.msra.mxu0 %v1016_v8  ;;  %241 = vmatpush.msrb.mxu3 %v1115_v25 }
  0x4b   :  { %285 = vmatpush.msra.mxu1 %v1021_v9 }
  0x4c   :  { %266 = vmatpush.msra.mxu0 %v1028_v10  ;;  %242 = vmatpush.msrb.mxu3 %v1139_v29 }
  0x4d   :  { %286 = vmatpush.msra.mxu1 %v1033_v11 }
  0x4e   :  { %267 = vmatpush.msra.mxu0 %v1040_v12  ;;  %243 = vmatpush.msrb.mxu3 %v1163_v33 }
  0x4f   :  { %287 = vmatpush.msra.mxu1 %v1045_v13 }
  0x50   :  { %268 = vmatpush.msra.mxu0 %v1067_v17  ;;  %244 = vmatpush.msrb.mxu3 %v1187_v37 }
  0x51   :  { %288 = vmatpush.msra.mxu1 %v1072_v18 }
  0x52   :  { %269 = vmatpush.msra.mxu0 %v1096_v22  ;;  %245 = vmatpush.msrb.mxu3 %v1211_v41 }
  0x53   :  { %289 = vmatpush.msra.mxu1 %v1101_v23 }
  0x54   :  { %270 = vmatpush.msra.mxu0 %v1120_v26  ;;  %246 = vmatpush.msrb.mxu3 %v1235_v45 }
  0x55   :  { %290 = vmatpush.msra.mxu1 %v1125_v27 }
  0x56   :  { %271 = vmatpush.msra.mxu0 %v1144_v30  ;;  %247 = vmatpush.msrb.mxu3 %v1349_v54 }
  0x57   :  { %291 = vmatpush.msra.mxu1 %v1149_v31 }
  0x58   :  { %272 = vmatpush.msra.mxu0 %v1168_v34  ;;  %248 = vmatpush.msrb.mxu3 %v1361_v56 }
  0x59   :  { %292 = vmatpush.msra.mxu1 %v1173_v35 }
  0x5a   :  { %273 = vmatpush.msra.mxu0 %v1192_v38  ;;  %249 = vmatpush.msrb.mxu3 %v1373_v58 }
  0x5b   :  { %293 = vmatpush.msra.mxu1 %v1197_v39 }
  0x5c   :  { %274 = vmatpush.msra.mxu0 %v1216_v42  ;;  %250 = vmatpush.msrb.mxu3 %v1385_v60 }
  0x5d   :  { %294 = vmatpush.msra.mxu1 %v1221_v43 }
  0x5e   :  { %275 = vmatpush.msra.mxu0 %v1240_v46  ;;  %251 = vmatpush.msrb.mxu3 %v1395_v62 }
  0x5f   :  { %295 = vmatpush.msra.mxu1 %v1245_v47 }
  0x60   :  { %276 = vmatpush.msra.mxu0 %v1259_v49  ;;  %252 = vmatpush.msrb.mxu3 %v1410_v52 }
  0x61   :  { %296 = vmatpush.msra.mxu1 %v1264_v50  ;;  %v2119_v50 = vmov 0.0  }
  0x62   :  { %345 = vmatpush.msrb.mxu0 %v970_v0  ;;  %170 = vmatmul.f32.vlgmr.msra.gmra.mxu3 %v2119_v50  ;;  %v1453_v50 = vld [vmem:[%s2068_s3] sm:$0xff] }
  0x63   :  { %253 = vmatpush.msrb.mxu3 %v1420_v63 }
  0x64   :  { %346 = vmatpush.msrb.mxu0 %v975_v1 }
  0x65   :  { %322 = vmatpush.msra.mxu3 %v1062_v16 }
  0x66   :  { %347 = vmatpush.msrb.mxu0 %v992_v4 }
  0x67   :  { %323 = vmatpush.msra.mxu3 %v1079_v19 }
  0x68   :  { %348 = vmatpush.msrb.mxu0 %v1004_v6 }
  0x69   :  { %324 = vmatpush.msra.mxu3 %v1091_v21 }
  0x6a   :  { %349 = vmatpush.msrb.mxu0 %v1016_v8 }
  0x6b   :  { %325 = vmatpush.msra.mxu3 %v1115_v25 }
  0x6c   :  { %350 = vmatpush.msrb.mxu0 %v1028_v10 }
  0x6d   :  { %326 = vmatpush.msra.mxu3 %v1139_v29 }
  0x6e   :  { %351 = vmatpush.msrb.mxu0 %v1040_v12 }
  0x6f   :  { %327 = vmatpush.msra.mxu3 %v1163_v33 }
  0x70   :  { %352 = vmatpush.msrb.mxu0 %v1067_v17 }
  0x71   :  { %328 = vmatpush.msra.mxu3 %v1187_v37 }
  0x72   :  { %353 = vmatpush.msrb.mxu0 %v1096_v22 }
  0x73   :  { %329 = vmatpush.msra.mxu3 %v1211_v41 }
  0x74   :  { %354 = vmatpush.msrb.mxu0 %v1120_v26 }
  0x75   :  { %330 = vmatpush.msra.mxu3 %v1235_v45 }
  0x76   :  { %355 = vmatpush.msrb.mxu0 %v1144_v30 }
  0x77   :  { %331 = vmatpush.msra.mxu3 %v1349_v54 }
  0x78   :  { %356 = vmatpush.msrb.mxu0 %v1168_v34 }
  0x79   :  { %332 = vmatpush.msra.mxu3 %v1361_v56 }
  0x7a   :  { %357 = vmatpush.msrb.mxu0 %v1192_v38 }
  0x7b   :  { %333 = vmatpush.msra.mxu3 %v1373_v58 }
  0x7c   :  { %358 = vmatpush.msrb.mxu0 %v1216_v42 }
  0x7d   :  { %334 = vmatpush.msra.mxu3 %v1385_v60 }
  0x7e   :  { %359 = vmatpush.msrb.mxu0 %v1240_v46 }
  0x7f   :  { %335 = vmatpush.msra.mxu3 %v1395_v62 }
  0x80   :  { %360 = vmatpush.msrb.mxu0 %v1259_v49 }
  0x81   :  { %336 = vmatpush.msra.mxu3 %v1410_v52 }
  0x83   :  { %337 = vmatpush.msra.mxu3 %v1420_v63  ;;  %v2123_v63 = vld [vmem:[#allocation8_spill] sm:$0xff] }
  0x9e   :  { %v110_v17 = vpop.f32.mrf.mxu0 }
  0x9f   :  { %v130_v12 = vpop.f32.mrf.mxu1  ;;  %v111_v22 = vadd.f32 %v110_v17, %v1453_v50  ;;  %v2120_v17 = vld [vmem:[#allocation12_spill] sm:$0xff] }
  0xa1   :  { %v131_v26 = vadd.f32 %v130_v12, %v111_v22  ;;  %v842_v22 = vld [vmem:[%s2067_s0 + $0x10] sm:$0xff] }
  0xa2   :  { %277 = vmatmul.f32.vlgmr.msra.gmra.mxu0 %v842_v22  ;;  %v2124_v22 = vld [vmem:[#allocation9_spill] sm:$0xff] }
  0xa3   :  { %849 = vtanh.f32 %v131_v26  ;;  %429 = vmatpush.msra.mxu0 %v970_v0  ;;  %v2121_v26 = vld [vmem:[#allocation6_spill] sm:$0xff] }
  0xa5   :  { %430 = vmatpush.msra.mxu0 %v975_v1 }
  0xa7   :  { %431 = vmatpush.msra.mxu0 %v992_v4 }
  0xa9   :  { %v850_v12 = vpop.eup %849  ;;  %432 = vmatpush.msra.mxu0 %v1004_v6 }
  0xaa   :  { %150 = vmatmul.f32.vlgmr.msra.gmra.mxu2 %v850_v12  ;;  %213 = vmatmul.f32.vlgmr.msrb.gmra.mxu1 %v850_v12  ;;  %v2122_v12 = vld [vmem:[#allocation7_spill] sm:$0xff] }
  0xab   :  { %302 = vmatpush.msra.mxu2 %v1052_v14  ;;  %365 = vmatpush.msrb.mxu1 %v980_v2 }
  0xac   :  { %433 = vmatpush.msra.mxu0 %v1016_v8 }
  0xad   :  { %303 = vmatpush.msra.mxu2 %v1057_v15  ;;  %366 = vmatpush.msrb.mxu1 %v987_v3 }
  0xae   :  { %434 = vmatpush.msra.mxu0 %v1028_v10 }
  0xaf   :  { %304 = vmatpush.msra.mxu2 %v1086_v20  ;;  %367 = vmatpush.msrb.mxu1 %v997_v5 }
  0xb0   :  { %435 = vmatpush.msra.mxu0 %v2121_v26 }
  0xb1   :  { %305 = vmatpush.msra.mxu2 %v1110_v24  ;;  %368 = vmatpush.msrb.mxu1 %v1009_v7 }
  0xb2   :  { %436 = vmatpush.msra.mxu0 %v2122_v12 }
  0xb3   :  { %306 = vmatpush.msra.mxu2 %v1134_v28  ;;  %369 = vmatpush.msrb.mxu1 %v1021_v9 }
  0xb4   :  { %437 = vmatpush.msra.mxu0 %v2123_v63  ;;  %v1546_v63 = vld [vmem:[%s2069_s4] sm:$0xff] }
  0xb5   :  { %307 = vmatpush.msra.mxu2 %v1158_v32  ;;  %370 = vmatpush.msrb.mxu1 %v1033_v11 }
  0xb6   :  { %438 = vmatpush.msra.mxu0 %v2124_v22 }
  0xb7   :  { %308 = vmatpush.msra.mxu2 %v1182_v36  ;;  %371 = vmatpush.msrb.mxu1 %v1045_v13 }
  0xb8   :  { %439 = vmatpush.msra.mxu0 %v1144_v30 }
  0xb9   :  { %309 = vmatpush.msra.mxu2 %v1206_v40  ;;  %372 = vmatpush.msrb.mxu1 %v1072_v18 }
  0xba   :  { %440 = vmatpush.msra.mxu0 %v1168_v34 }
  0xbb   :  { %310 = vmatpush.msra.mxu2 %v1230_v44  ;;  %373 = vmatpush.msrb.mxu1 %v1101_v23 }
  0xbc   :  { %441 = vmatpush.msra.mxu0 %v1192_v38 }
  0xbd   :  { %311 = vmatpush.msra.mxu2 %v1254_v48  ;;  %374 = vmatpush.msrb.mxu1 %v1125_v27 }
  0xbe   :  { %v194_v52 = vpop.f32.mrf.mxu0  ;;  %442 = vmatpush.msra.mxu0 %v1216_v42 }
  0xbf   :  { %312 = vmatpush.msra.mxu2 %v1344_v53  ;;  %375 = vmatpush.msrb.mxu1 %v1149_v31  ;;  %v195_v0 = vadd.f32 %v194_v52, %v1453_v50 }
  0xc0   :  { %443 = vmatpush.msra.mxu0 %v1240_v46 }
  0xc1   :  { %313 = vmatpush.msra.mxu2 %v1356_v55  ;;  %376 = vmatpush.msrb.mxu1 %v1173_v35 }
  0xc2   :  { %444 = vmatpush.msra.mxu0 %v1259_v49 }
  0xc3   :  { %314 = vmatpush.msra.mxu2 %v1368_v57  ;;  %377 = vmatpush.msrb.mxu1 %v1197_v39 }
  0xc5   :  { %315 = vmatpush.msra.mxu2 %v1380_v59  ;;  %378 = vmatpush.msrb.mxu1 %v1221_v43 }
  0xc7   :  { %316 = vmatpush.msra.mxu2 %v1390_v61  ;;  %379 = vmatpush.msrb.mxu1 %v1245_v47 }
  0xc9   :  { %317 = vmatpush.msra.mxu2 %v1405_v51  ;;  %380 = vmatpush.msrb.mxu1 %v2120_v17 }
  0xe5   :  { %v171_v52 = vpop.f32.mrf.mxu3 }
 0x127   :  { %v214_v6 = vpop.f32.mrf.mxu1 }
 0x128   :  { %v215_v4 = vadd.f32 %v214_v6, %v195_v0  ;;  %v2125_v6 = vld [vmem:[#allocation15_spill] sm:$0xff] }
 0x12a   :  { %851 = vtanh.f32 %v215_v4 }
 0x12d   :  { %v151_v22 = vpop.f32.mrf.mxu2 }
 0x12e   :  { %v152_v30 = vadd.f32 %v151_v22, %v1546_v63  ;;  %v2127_v22 = vld [vmem:[#allocation2_spill] sm:$0xff] }
 0x130   :  { %v852_v34 = vpop.eup %851  ;;  %v172_v0 = vadd.f32 %v171_v52, %v152_v30  ;;  %v2126_v30 = vld [vmem:[#allocation16_spill] sm:$0xff] }
 0x131   :  { %234 = vmatmul.f32.vlgmr.msrb.gmra.mxu2 %v852_v34  ;;  %297 = vmatmul.f32.vlgmr.msra.gmra.mxu1 %v852_v34  ;;  %v843_v34 = vld [vmem:[%s2067_s0 + $0x18] sm:$0xff]  ;;  %v2128_v52 = vld [vmem:[#allocation4_spill] sm:$0xff] }
 0x132   :  { %853 = vtanh.f32 %v172_v0  ;;  %386 = vmatpush.msrb.mxu2 %v1052_v14  ;;  %449 = vmatpush.msra.mxu1 %v980_v2  ;;  %v2129_v0 = vld [vmem:[#allocation5_spill] sm:$0xff] }
 0x133   :  { %361 = vmatmul.f32.vlgmr.msrb.gmra.mxu0 %v843_v34  ;;  %v2131_v34 = vld [vmem:[#allocation9_spill] sm:$0xff] }
 0x134   :  { %387 = vmatpush.msrb.mxu2 %v1057_v15  ;;  %450 = vmatpush.msra.mxu1 %v987_v3 }
 0x135   :  { %513 = vmatpush.msrb.mxu0 %v2127_v22 }
 0x136   :  { %388 = vmatpush.msrb.mxu2 %v1086_v20  ;;  %451 = vmatpush.msra.mxu1 %v997_v5 }
 0x137   :  { %514 = vmatpush.msrb.mxu0 %v975_v1  ;;  %v2132_v1 = vld [vmem:[#allocation10_spill] sm:$0xff] }
 0x138   :  { %v854_v4 = vpop.eup %853  ;;  %389 = vmatpush.msrb.mxu2 %v1110_v24  ;;  %452 = vmatpush.msra.mxu1 %v1009_v7 }
 0x139   :  { %254 = vmatmul.f32.vlgmr.msrb.gmra.mxu3 %v854_v4  ;;  %515 = vmatpush.msrb.mxu0 %v2128_v52  ;;  %v2130_v4 = vld [vmem:[#allocation8_spill] sm:$0xff]  ;;  %v2133_v52 = vld [vmem:[#allocation11_spill] sm:$0xff] }
 0x13a   :  { %390 = vmatpush.msrb.mxu2 %v1134_v28  ;;  %453 = vmatpush.msra.mxu1 %v1021_v9 }
 0x13b   :  { %406 = vmatpush.msrb.mxu3 %v1062_v16  ;;  %516 = vmatpush.msrb.mxu0 %v2129_v0 }
 0x13c   :  { %391 = vmatpush.msrb.mxu2 %v1158_v32  ;;  %454 = vmatpush.msra.mxu1 %v1033_v11 }
 0x13d   :  { %407 = vmatpush.msrb.mxu3 %v1079_v19  ;;  %517 = vmatpush.msrb.mxu0 %v1016_v8 }
 0x13e   :  { %392 = vmatpush.msrb.mxu2 %v1182_v36  ;;  %455 = vmatpush.msra.mxu1 %v1045_v13 }
 0x13f   :  { %408 = vmatpush.msrb.mxu3 %v1091_v21  ;;  %518 = vmatpush.msrb.mxu0 %v1028_v10 }
 0x140   :  { %393 = vmatpush.msrb.mxu2 %v1206_v40  ;;  %456 = vmatpush.msra.mxu1 %v1072_v18 }
 0x141   :  { %409 = vmatpush.msrb.mxu3 %v1115_v25  ;;  %519 = vmatpush.msrb.mxu0 %v2121_v26 }
 0x142   :  { %394 = vmatpush.msrb.mxu2 %v1230_v44  ;;  %457 = vmatpush.msra.mxu1 %v1101_v23 }
 0x143   :  { %410 = vmatpush.msrb.mxu3 %v1139_v29  ;;  %520 = vmatpush.msrb.mxu0 %v2122_v12 }
 0x144   :  { %395 = vmatpush.msrb.mxu2 %v1254_v48  ;;  %458 = vmatpush.msra.mxu1 %v1125_v27 }
 0x145   :  { %411 = vmatpush.msrb.mxu3 %v1163_v33  ;;  %521 = vmatpush.msrb.mxu0 %v2130_v4 }
 0x146   :  { %396 = vmatpush.msrb.mxu2 %v1344_v53  ;;  %459 = vmatpush.msra.mxu1 %v1149_v31 }
 0x147   :  { %412 = vmatpush.msrb.mxu3 %v1187_v37  ;;  %522 = vmatpush.msrb.mxu0 %v2131_v34 }
 0x148   :  { %397 = vmatpush.msrb.mxu2 %v1356_v55  ;;  %460 = vmatpush.msra.mxu1 %v1173_v35 }
 0x149   :  { %413 = vmatpush.msrb.mxu3 %v1211_v41  ;;  %523 = vmatpush.msrb.mxu0 %v2132_v1 }
 0x14a   :  { %398 = vmatpush.msrb.mxu2 %v1368_v57  ;;  %461 = vmatpush.msra.mxu1 %v1197_v39 }
 0x14b   :  { %414 = vmatpush.msrb.mxu3 %v1235_v45  ;;  %524 = vmatpush.msrb.mxu0 %v2133_v52 }
 0x14c   :  { %399 = vmatpush.msrb.mxu2 %v1380_v59  ;;  %462 = vmatpush.msra.mxu1 %v1221_v43 }
 0x14d   :  { %415 = vmatpush.msrb.mxu3 %v1349_v54  ;;  %525 = vmatpush.msrb.mxu0 %v1192_v38 }
 0x14e   :  { %400 = vmatpush.msrb.mxu2 %v1390_v61  ;;  %463 = vmatpush.msra.mxu1 %v1245_v47 }
 0x14f   :  { %416 = vmatpush.msrb.mxu3 %v1361_v56  ;;  %526 = vmatpush.msrb.mxu0 %v1216_v42 }
 0x150   :  { %401 = vmatpush.msrb.mxu2 %v1405_v51  ;;  %464 = vmatpush.msra.mxu1 %v2120_v17 }
 0x151   :  { %417 = vmatpush.msrb.mxu3 %v1373_v58  ;;  %527 = vmatpush.msrb.mxu0 %v1240_v46 }
 0x153   :  { %418 = vmatpush.msrb.mxu3 %v1385_v60  ;;  %528 = vmatpush.msrb.mxu0 %v1259_v49 }
 0x155   :  { %419 = vmatpush.msrb.mxu3 %v1395_v62 }
 0x157   :  { %420 = vmatpush.msrb.mxu3 %v2125_v6 }
 0x159   :  { %421 = vmatpush.msrb.mxu3 %v2126_v30  ;;  %v278_v30 = vpop.f32.mrf.mxu0 }
 0x15a   :  { %v279_v22 = vadd.f32 %v278_v30, %v1453_v50 }
 0x1ae   :  { %v298_v0 = vpop.f32.mrf.mxu1 }
 0x1af   :  { %v299_v6 = vadd.f32 %v298_v0, %v279_v22  ;;  %v2134_v0 = vld [vmem:[#allocation15_spill] sm:$0xff] }
 0x1b1   :  { %855 = vtanh.f32 %v299_v6 }
 0x1b4   :  { %v235_v12 = vpop.f32.mrf.mxu2 }
 0x1b5   :  { %v236_v30 = vadd.f32 %v235_v12, %v1546_v63 }
 0x1b7   :  { %v856_v4 = vpop.eup %855 }
 0x1b8   :  { %318 = vmatmul.f32.vlgmr.msra.gmra.mxu2 %v856_v4  ;;  %381 = vmatmul.f32.vlgmr.msrb.gmra.mxu1 %v856_v4  ;;  %v2135_v4 = vld [vmem:[#allocation16_spill] sm:$0xff] }
 0x1b9   :  { %470 = vmatpush.msra.mxu2 %v1052_v14  ;;  %533 = vmatpush.msrb.mxu1 %v980_v2 }
 0x1bb   :  { %471 = vmatpush.msra.mxu2 %v1057_v15  ;;  %534 = vmatpush.msrb.mxu1 %v987_v3 }
 0x1bc   :  { %v255_v6 = vpop.f32.mrf.mxu3 }
 0x1bd   :  { %v256_v22 = vadd.f32 %v255_v6, %v236_v30  ;;  %472 = vmatpush.msra.mxu2 %v1086_v20  ;;  %535 = vmatpush.msrb.mxu1 %v997_v5  ;;  %v844_v30 = vld [vmem:[%s2067_s0 + $0x20] sm:$0xff] }
 0x1be   :  { %445 = vmatmul.f32.vlgmr.msra.gmra.mxu0 %v844_v30  ;;  %v2136_v6 = vld [vmem:[#allocation2_spill] sm:$0xff] }
 0x1bf   :  { %857 = vtanh.f32 %v256_v22  ;;  %473 = vmatpush.msra.mxu2 %v1110_v24  ;;  %536 = vmatpush.msrb.mxu1 %v1009_v7  ;;  %v2137_v22 = vld [vmem:[#allocation3_spill] sm:$0xff] }
 0x1c0   :  { %597 = vmatpush.msra.mxu0 %v2136_v6 }
 0x1c1   :  { %474 = vmatpush.msra.mxu2 %v1134_v28  ;;  %537 = vmatpush.msrb.mxu1 %v1021_v9 }
 0x1c2   :  { %598 = vmatpush.msra.mxu0 %v2137_v22  ;;  %v908_v22 = vld [vmem:[%s2065_s1 + $0xb8] sm:$0xff] }
 0x1c3   :  { %475 = vmatpush.msra.mxu2 %v1158_v32  ;;  %538 = vmatpush.msrb.mxu1 %v1033_v11 }
 0x1c5   :  { %v858_v12 = vpop.eup %857  ;;  %476 = vmatpush.msra.mxu2 %v1182_v36  ;;  %539 = vmatpush.msrb.mxu1 %v1045_v13 }
 0x1c6   :  { %338 = vmatmul.f32.vlgmr.msra.gmra.mxu3 %v858_v12  ;;  %v2138_v12 = vld [vmem:[#allocation4_spill] sm:$0xff] }
 0x1c7   :  { %477 = vmatpush.msra.mxu2 %v1206_v40  ;;  %540 = vmatpush.msrb.mxu1 %v1072_v18 }
 0x1c8   :  { %490 = vmatpush.msra.mxu3 %v1062_v16  ;;  %599 = vmatpush.msra.mxu0 %v2138_v12  ;;  %v909_v12 = vld [vmem:[%s2065_s1 + $0xb0] sm:$0xff] }
 0x1c9   :  { %478 = vmatpush.msra.mxu2 %v1230_v44  ;;  %541 = vmatpush.msrb.mxu1 %v1101_v23 }
 0x1ca   :  { %491 = vmatpush.msra.mxu3 %v1079_v19 }
 0x1cb   :  { %479 = vmatpush.msra.mxu2 %v1254_v48  ;;  %542 = vmatpush.msrb.mxu1 %v1125_v27 }
 0x1cc   :  { %492 = vmatpush.msra.mxu3 %v1091_v21 }
 0x1cd   :  { %480 = vmatpush.msra.mxu2 %v1344_v53  ;;  %543 = vmatpush.msrb.mxu1 %v1149_v31 }
 0x1ce   :  { %493 = vmatpush.msra.mxu3 %v1115_v25 }
 0x1cf   :  { %481 = vmatpush.msra.mxu2 %v1356_v55  ;;  %544 = vmatpush.msrb.mxu1 %v1173_v35 }
 0x1d0   :  { %494 = vmatpush.msra.mxu3 %v1139_v29 }
 0x1d1   :  { %482 = vmatpush.msra.mxu2 %v1368_v57  ;;  %545 = vmatpush.msrb.mxu1 %v1197_v39 }
 0x1d2   :  { %495 = vmatpush.msra.mxu3 %v1163_v33 }
 0x1d3   :  { %483 = vmatpush.msra.mxu2 %v1380_v59  ;;  %546 = vmatpush.msrb.mxu1 %v1221_v43 }
 0x1d4   :  { %496 = vmatpush.msra.mxu3 %v1187_v37 }
 0x1d5   :  { %484 = vmatpush.msra.mxu2 %v1390_v61  ;;  %547 = vmatpush.msrb.mxu1 %v1245_v47 }
 0x1d6   :  { %497 = vmatpush.msra.mxu3 %v1211_v41 }
 0x1d7   :  { %485 = vmatpush.msra.mxu2 %v1405_v51  ;;  %548 = vmatpush.msrb.mxu1 %v2120_v17 }
 0x1d8   :  { %498 = vmatpush.msra.mxu3 %v1235_v45 }
 0x1da   :  { %499 = vmatpush.msra.mxu3 %v1349_v54 }
 0x1dc   :  { %500 = vmatpush.msra.mxu3 %v1361_v56 }
 0x1de   :  { %501 = vmatpush.msra.mxu3 %v1373_v58  ;;  %v2139_v58 = vld [vmem:[#allocation5_spill] sm:$0xff] }
 0x1df   :  { %600 = vmatpush.msra.mxu0 %v2139_v58 }
 0x1e0   :  { %502 = vmatpush.msra.mxu3 %v1385_v60 }
 0x1e1   :  { %601 = vmatpush.msra.mxu0 %v1016_v8 }
 0x1e2   :  { %503 = vmatpush.msra.mxu3 %v1395_v62  ;;  %v362_v62 = vpop.f32.mrf.mxu0 }
 0x1e3   :  { %602 = vmatpush.msra.mxu0 %v1028_v10  ;;  %v363_v30 = vadd.f32 %v362_v62, %v1453_v50 }
 0x1e4   :  { %504 = vmatpush.msra.mxu3 %v2134_v0  ;;  %v2141_v0 = vld [vmem:[#allocation8_spill] sm:$0xff] }
 0x1e5   :  { %603 = vmatpush.msra.mxu0 %v2121_v26  ;;  %v1844_v26 = vld [vmem:[%s2066_s2 + $0x40] sm:$0xff] }
 0x1e6   :  { %505 = vmatpush.msra.mxu3 %v2135_v4  ;;  %v2140_v4 = vld [vmem:[#allocation7_spill] sm:$0xff] }
 0x1e7   :  { %604 = vmatpush.msra.mxu0 %v2140_v4  ;;  %v1853_v4 = vld [vmem:[%s2066_s2 + $0x38] sm:$0xff] }
 0x1e9   :  { %605 = vmatpush.msra.mxu0 %v2141_v0 }
 0x1eb   :  { %606 = vmatpush.msra.mxu0 %v2131_v34 }
 0x1ed   :  { %607 = vmatpush.msra.mxu0 %v2132_v1 }
 0x1ef   :  { %608 = vmatpush.msra.mxu0 %v2133_v52 }
 0x1f1   :  { %609 = vmatpush.msra.mxu0 %v1192_v38 }
 0x1f3   :  { %610 = vmatpush.msra.mxu0 %v1216_v42 }
 0x1f5   :  { %611 = vmatpush.msra.mxu0 %v1240_v46 }
 0x1f7   :  { %612 = vmatpush.msra.mxu0 %v1259_v49 }
 0x235   :  { %v382_v58 = vpop.f32.mrf.mxu1 }
 0x236   :  { %v383_v6 = vadd.f32 %v382_v58, %v363_v30  ;;  %v910_v30 = vld [vmem:[%s2065_s1 + $0xa8] sm:$0xff]  ;;  %v911_v58 = vld [vmem:[%s2065_s1 + $0xa0] sm:$0xff] }
 0x238   :  { %859 = vtanh.f32 %v383_v6  ;;  %v912_v6 = vld [vmem:[%s2065_s1 + $0x98] sm:$0xff] }
 0x23b   :  { %v319_v10 = vpop.f32.mrf.mxu2 }
 0x23c   :  { %v320_v62 = vadd.f32 %v319_v10, %v1546_v63  ;;  %v1882_v10 = vld [vmem:[%s2066_s2 + $0xf8] sm:$0xff] }
 0x23e   :  { %v860_v8 = vpop.eup %859 }
 0x23f   :  { %402 = vmatmul.f32.vlgmr.msrb.gmra.mxu2 %v860_v8  ;;  %465 = vmatmul.f32.vlgmr.msra.gmra.mxu1 %v860_v8  ;;  %v913_v8 = vld [vmem:[%s2065_s1 + $0x90] sm:$0xff] }
 0x240   :  { %554 = vmatpush.msrb.mxu2 %v1052_v14  ;;  %617 = vmatpush.msra.mxu1 %v980_v2 }
 0x242   :  { %555 = vmatpush.msrb.mxu2 %v1057_v15  ;;  %618 = vmatpush.msra.mxu1 %v987_v3  ;;  %v881_v15 = vld [vmem:[%s2065_s1 + $0x78] sm:$0xff] }
 0x244   :  { %556 = vmatpush.msrb.mxu2 %v1086_v20  ;;  %619 = vmatpush.msra.mxu1 %v997_v5  ;;  %v2142_v5 = vld [vmem:[#allocation13_spill] sm:$0xff] }
 0x245   :  { %v885_v20 = vld [vmem:[%s2065_s1 + $0x58] sm:$0xff] }
 0x246   :  { %557 = vmatpush.msrb.mxu2 %v1110_v24  ;;  %620 = vmatpush.msra.mxu1 %v1009_v7  ;;  %v2143_v7 = vld [vmem:[#allocation14_spill] sm:$0xff] }
 0x247   :  { %v888_v24 = vld [vmem:[%s2065_s1 + $0x40] sm:$0xff] }
 0x248   :  { %558 = vmatpush.msrb.mxu2 %v1134_v28  ;;  %621 = vmatpush.msra.mxu1 %v1021_v9  ;;  %v2144_v9 = vld [vmem:[#allocation15_spill] sm:$0xff]  ;;  %v890_v28 = vld [vmem:[%s2065_s1 + $0x30] sm:$0xff] }
 0x249   :  { %v339_v2 = vpop.f32.mrf.mxu3 }
 0x24a   :  { %v340_v14 = vadd.f32 %v339_v2, %v320_v62  ;;  %559 = vmatpush.msrb.mxu2 %v1158_v32  ;;  %622 = vmatpush.msra.mxu1 %v1033_v11  ;;  %v2145_v11 = vld [vmem:[#allocation16_spill] sm:$0xff]  ;;  %v915_v62 = vld [vmem:[%s2065_s1 + $0x88] sm:$0xff] }
 0x24b   :  { %v916_v2 = vld [vmem:[%s2066_s2 + $0xf0] sm:$0xff] }
 0x24c   :  { %861 = vtanh.f32 %v340_v14  ;;  %560 = vmatpush.msrb.mxu2 %v1182_v36  ;;  %623 = vmatpush.msra.mxu1 %v1045_v13  ;;  %v845_v13 = vld [vmem:[%s2067_s0 + $0x28] sm:$0xff]  ;;  %v1789_v36 = vld [vmem:[%s2066_s2 + $0x70] sm:$0xff]  ;;  %v917_v14 = vld [vmem:[%s2065_s1 + $0x80] sm:$0xff] }
 0x24d   :  { %529 = vmatmul.f32.vlgmr.msrb.gmra.mxu0 %v845_v13  ;;  %v919_v13 = vld [vmem:[%s2066_s2 + $0xe0] sm:$0xff] }
 0x24e   :  { %561 = vmatpush.msrb.mxu2 %v1206_v40  ;;  %624 = vmatpush.msra.mxu1 %v1072_v18  ;;  %v883_v18 = vld [vmem:[%s2065_s1 + $0x68] sm:$0xff]  ;;  %v1807_v40 = vld [vmem:[%s2066_s2 + $0x60] sm:$0xff] }
 0x24f   :  { %681 = vmatpush.msrb.mxu0 %v881_v15  ;;  %v920_v15 = vld [vmem:[%s2066_s2 + $0xd8] sm:$0xff] }
 0x250   :  { %562 = vmatpush.msrb.mxu2 %v1230_v44  ;;  %625 = vmatpush.msra.mxu1 %v1101_v23  ;;  %v887_v23 = vld [vmem:[%s2065_s1 + $0x48] sm:$0xff]  ;;  %v1825_v44 = vld [vmem:[%s2066_s2 + $0x50] sm:$0xff] }
 0x252   :  { %v862_v3 = vpop.eup %861  ;;  %563 = vmatpush.msrb.mxu2 %v1254_v48  ;;  %626 = vmatpush.msra.mxu1 %v1125_v27  ;;  %v446_v27 = vpop.f32.mrf.mxu0 }
 0x253   :  { %422 = vmatmul.f32.vlgmr.msrb.gmra.mxu3 %v862_v3  ;;  %v918_v3 = vld [vmem:[%s2066_s2 + $0xe8] sm:$0xff] }
 0x254   :  { %564 = vmatpush.msrb.mxu2 %v1344_v53  ;;  %627 = vmatpush.msra.mxu1 %v1149_v31 }
 0x255   :  { %574 = vmatpush.msrb.mxu3 %v1062_v16  ;;  %v882_v16 = vld [vmem:[%s2065_s1 + $0x70] sm:$0xff] }
 0x256   :  { %565 = vmatpush.msrb.mxu2 %v1356_v55  ;;  %628 = vmatpush.msra.mxu1 %v1173_v35  ;;  %v892_v35 = vld [vmem:[%s2065_s1 + $0xf8] sm:$0xff] }
 0x257   :  { %575 = vmatpush.msrb.mxu3 %v1079_v19  ;;  %682 = vmatpush.msrb.mxu0 %v882_v16  ;;  %v884_v19 = vld [vmem:[%s2065_s1 + $0x60] sm:$0xff]  ;;  %v921_v16 = vld [vmem:[%s2066_s2 + $0xd0] sm:$0xff] }
 0x258   :  { %566 = vmatpush.msrb.mxu2 %v1368_v57  ;;  %629 = vmatpush.msra.mxu1 %v1197_v39  ;;  %v896_v39 = vld [vmem:[%s2065_s1 + $0xe8] sm:$0xff] }
 0x259   :  { %576 = vmatpush.msrb.mxu3 %v1091_v21  ;;  %683 = vmatpush.msrb.mxu0 %v883_v18  ;;  %v886_v21 = vld [vmem:[%s2065_s1 + $0x50] sm:$0xff]  ;;  %v922_v18 = vld [vmem:[%s2066_s2 + $0xc8] sm:$0xff] }
 0x25a   :  { %567 = vmatpush.msrb.mxu2 %v1380_v59  ;;  %630 = vmatpush.msra.mxu1 %v1221_v43  ;;  %v900_v43 = vld [vmem:[%s2065_s1 + $0xd8] sm:$0xff] }
 0x25b   :  { %577 = vmatpush.msrb.mxu3 %v1115_v25  ;;  %684 = vmatpush.msrb.mxu0 %v884_v19  ;;  %v889_v25 = vld [vmem:[%s2065_s1 + $0x38] sm:$0xff]  ;;  %v923_v19 = vld [vmem:[%s2066_s2 + $0xc0] sm:$0xff] }
 0x25c   :  { %568 = vmatpush.msrb.mxu2 %v1390_v61  ;;  %631 = vmatpush.msra.mxu1 %v1245_v47  ;;  %v1834_v47 = vld [vmem:[%s2066_s2 + $0x48] sm:$0xff] }
 0x25d   :  { %578 = vmatpush.msrb.mxu3 %v1139_v29  ;;  %685 = vmatpush.msrb.mxu0 %v885_v20  ;;  %v447_v29 = vadd.f32 %v446_v27, %v1453_v50  ;;  %v924_v20 = vld [vmem:[%s2066_s2 + $0xb8] sm:$0xff] }
 0x25e   :  { %569 = vmatpush.msrb.mxu2 %v1405_v51  ;;  %632 = vmatpush.msra.mxu1 %v2120_v17 }
 0x25f   :  { %579 = vmatpush.msrb.mxu3 %v1163_v33  ;;  %686 = vmatpush.msrb.mxu0 %v886_v21  ;;  %v846_v21 = vld [vmem:[%s2067_s0 + $0x30] sm:$0xff] }
 0x260   :  { %613 = vmatmul.f32.vlgmr.msra.gmra.mxu0 %v846_v21  ;;  %v780_v21 = vld [vmem:[%s2070_s5 + $0x88] sm:$0xff] }
 0x261   :  { %580 = vmatpush.msrb.mxu3 %v1187_v37  ;;  %687 = vmatpush.msrb.mxu0 %v887_v23  ;;  %v894_v37 = vld [vmem:[%s2065_s1 + $0xf0] sm:$0xff] }
 0x263   :  { %581 = vmatpush.msrb.mxu3 %v1211_v41  ;;  %688 = vmatpush.msrb.mxu0 %v888_v24  ;;  %v898_v41 = vld [vmem:[%s2065_s1 + $0xe0] sm:$0xff] }
 0x265   :  { %582 = vmatpush.msrb.mxu3 %v1235_v45  ;;  %689 = vmatpush.msrb.mxu0 %v889_v25  ;;  %v902_v45 = vld [vmem:[%s2065_s1 + $0xd0] sm:$0xff] }
 0x267   :  { %583 = vmatpush.msrb.mxu3 %v1349_v54  ;;  %690 = vmatpush.msrb.mxu0 %v890_v28 }
 0x269   :  { %584 = vmatpush.msrb.mxu3 %v1361_v56  ;;  %691 = vmatpush.msrb.mxu0 %v2132_v1  ;;  %v1780_v1 = vld [vmem:[%s2066_s2 + $0x78] sm:$0xff] }
 0x26b   :  { %585 = vmatpush.msrb.mxu3 %v2142_v5  ;;  %692 = vmatpush.msrb.mxu0 %v2133_v52  ;;  %v906_v52 = vld [vmem:[%s2065_s1 + $0xc0] sm:$0xff] }
 0x26d   :  { %586 = vmatpush.msrb.mxu3 %v1385_v60  ;;  %693 = vmatpush.msrb.mxu0 %v1192_v38  ;;  %v1798_v38 = vld [vmem:[%s2066_s2 + $0x68] sm:$0xff] }
 0x26f   :  { %587 = vmatpush.msrb.mxu3 %v2143_v7  ;;  %694 = vmatpush.msrb.mxu0 %v1216_v42  ;;  %v1816_v42 = vld [vmem:[%s2066_s2 + $0x58] sm:$0xff] }
 0x271   :  { %588 = vmatpush.msrb.mxu3 %v2144_v9  ;;  %695 = vmatpush.msrb.mxu0 %v1240_v46 }
 0x273   :  { %589 = vmatpush.msrb.mxu3 %v2145_v11  ;;  %696 = vmatpush.msrb.mxu0 %v1259_v49  ;;  %v904_v49 = vld [vmem:[%s2065_s1 + $0xc8] sm:$0xff] }
 0x2bc   :  { %v466_v31 = vpop.f32.mrf.mxu1 }
 0x2bd   :  { %v467_v32 = vadd.f32 %v466_v31, %v447_v29  ;;  %v925_v31 = vld [vmem:[%s2066_s2 + $0x30] sm:$0xff] }
 0x2bf   :  { %863 = vtanh.f32 %v467_v32 }
 0x2c2   :  { %v403_v46 = vpop.f32.mrf.mxu2 }
 0x2c3   :  { %v404_v17 = vadd.f32 %v403_v46, %v1546_v63  ;;  %v766_v46 = vld [vmem:[%s2070_s5 + $0x18] sm:$0xff] }
 0x2c5   :  { %v864_v33 = vpop.eup %863 }
 0x2c6   :  { %486 = vmatmul.f32.vlgmr.msra.gmra.mxu2 %v864_v33  ;;  %549 = vmatmul.f32.vlgmr.msrb.gmra.mxu1 %v864_v33 }
 0x2c7   :  { %638 = vmatpush.msra.mxu2 %v1780_v1  ;;  %701 = vmatpush.msrb.mxu1 %v892_v35 }
 0x2c9   :  { %639 = vmatpush.msra.mxu2 %v1789_v36  ;;  %702 = vmatpush.msrb.mxu1 %v894_v37  ;;  %v770_v37 = vld [vmem:[%s2070_s5 + $0x38] sm:$0xff] }
 0x2ca   :  { %v530_v23 = vpop.f32.mrf.mxu0 }
 0x2cb   :  { %640 = vmatpush.msra.mxu2 %v1798_v38  ;;  %703 = vmatpush.msrb.mxu1 %v896_v39  ;;  %v531_v24 = vadd.f32 %v530_v23, %v1453_v50  ;;  %v779_v23 = vld [vmem:[%s2070_s5 + $0x80] sm:$0xff] }
 0x2cd   :  { %641 = vmatpush.msra.mxu2 %v1807_v40  ;;  %704 = vmatpush.msrb.mxu1 %v898_v41 }
 0x2cf   :  { %642 = vmatpush.msra.mxu2 %v1816_v42  ;;  %705 = vmatpush.msrb.mxu1 %v900_v43 }
 0x2d1   :  { %643 = vmatpush.msra.mxu2 %v1825_v44  ;;  %706 = vmatpush.msrb.mxu1 %v902_v45  ;;  %v767_v45 = vld [vmem:[%s2070_s5 + $0x20] sm:$0xff] }
 0x2d3   :  { %644 = vmatpush.msra.mxu2 %v1834_v47  ;;  %707 = vmatpush.msrb.mxu1 %v904_v49  ;;  %v764_v49 = vld [vmem:[%s2070_s5 + $0x8] sm:$0xff] }
 0x2d5   :  { %645 = vmatpush.msra.mxu2 %v1844_v26  ;;  %708 = vmatpush.msrb.mxu1 %v906_v52 }
 0x2d6   :  { %v423_v34 = vpop.f32.mrf.mxu3 }
 0x2d7   :  { %v424_v0 = vadd.f32 %v423_v34, %v404_v17  ;;  %646 = vmatpush.msra.mxu2 %v1853_v4  ;;  %709 = vmatpush.msrb.mxu1 %v908_v22  ;;  %v763_v17 = vld [vmem:[%s2070_s5] sm:$0xff] }
 0x2d9   :  { %865 = vtanh.f32 %v424_v0  ;;  %647 = vmatpush.msra.mxu2 %v1254_v48  ;;  %710 = vmatpush.msrb.mxu1 %v909_v12 }
 0x2db   :  { %648 = vmatpush.msra.mxu2 %v1344_v53  ;;  %711 = vmatpush.msrb.mxu1 %v910_v30 }
 0x2dd   :  { %649 = vmatpush.msra.mxu2 %v1356_v55  ;;  %712 = vmatpush.msrb.mxu1 %v911_v58 }
 0x2df   :  { %v866_v48 = vpop.eup %865  ;;  %650 = vmatpush.msra.mxu2 %v1368_v57  ;;  %713 = vmatpush.msrb.mxu1 %v912_v6  ;;  %v794_v6 = vld [vmem:[%s2070_s5 + $0xf8] sm:$0xff] }
 0x2e0   :  { %506 = vmatmul.f32.vlgmr.msra.gmra.mxu3 %v866_v48 }
 0x2e1   :  { %651 = vmatpush.msra.mxu2 %v1380_v59  ;;  %714 = vmatpush.msrb.mxu1 %v913_v8  ;;  %v792_v8 = vld [vmem:[%s2070_s5 + $0xe8] sm:$0xff] }
 0x2e2   :  { %658 = vmatpush.msra.mxu3 %v1882_v10 }
 0x2e3   :  { %652 = vmatpush.msra.mxu2 %v1390_v61  ;;  %715 = vmatpush.msrb.mxu1 %v915_v62  ;;  %v790_v62 = vld [vmem:[%s2070_s5 + $0xd8] sm:$0xff] }
 0x2e4   :  { %659 = vmatpush.msra.mxu3 %v916_v2 }
 0x2e5   :  { %653 = vmatpush.msra.mxu2 %v1405_v51  ;;  %716 = vmatpush.msrb.mxu1 %v917_v14  ;;  %v788_v14 = vld [vmem:[%s2070_s5 + $0xc8] sm:$0xff] }
 0x2e6   :  { %660 = vmatpush.msra.mxu3 %v918_v3 }
 0x2e8   :  { %661 = vmatpush.msra.mxu3 %v919_v13 }
 0x2ea   :  { %662 = vmatpush.msra.mxu3 %v920_v15 }
 0x2ec   :  { %663 = vmatpush.msra.mxu3 %v921_v16 }
 0x2ee   :  { %664 = vmatpush.msra.mxu3 %v922_v18 }
 0x2f0   :  { %665 = vmatpush.msra.mxu3 %v923_v19 }
 0x2f2   :  { %666 = vmatpush.msra.mxu3 %v924_v20 }
 0x2f4   :  { %667 = vmatpush.msra.mxu3 %v1349_v54 }
 0x2f6   :  { %668 = vmatpush.msra.mxu3 %v1361_v56 }
 0x2f8   :  { %669 = vmatpush.msra.mxu3 %v2142_v5 }
 0x2fa   :  { %670 = vmatpush.msra.mxu3 %v1385_v60 }
 0x2fc   :  { %671 = vmatpush.msra.mxu3 %v2143_v7 }
 0x2fe   :  { %672 = vmatpush.msra.mxu3 %v2144_v9 }
 0x300   :  { %673 = vmatpush.msra.mxu3 %v2145_v11 }
 0x343   :  { %v550_v25 = vpop.f32.mrf.mxu1 }
 0x344   :  { %v551_v27 = vadd.f32 %v550_v25, %v531_v24 }
 0x346   :  { %867 = vtanh.f32 %v551_v27 }
 0x349   :  { %v487_v29 = vpop.f32.mrf.mxu2 }
 0x34a   :  { %v488_v32 = vadd.f32 %v487_v29, %v1546_v63 }
 0x34c   :  { %v868_v28 = vpop.eup %867 }
 0x34d   :  { %570 = vmatmul.f32.vlgmr.msrb.gmra.mxu2 %v868_v28  ;;  %633 = vmatmul.f32.vlgmr.msra.gmra.mxu1 %v868_v28 }
 0x34e   :  { %722 = vmatpush.msrb.mxu2 %v1780_v1  ;;  %816 = vmatpush.msra.mxu1 %v794_v6 }
 0x350   :  { %723 = vmatpush.msrb.mxu2 %v1789_v36  ;;  %v771_v36 = vld [vmem:[%s2070_s5 + $0x40] sm:$0xff] }
 0x352   :  { %724 = vmatpush.msrb.mxu2 %v1798_v38  ;;  %v769_v38 = vld [vmem:[%s2070_s5 + $0x30] sm:$0xff] }
 0x354   :  { %725 = vmatpush.msrb.mxu2 %v1807_v40 }
 0x356   :  { %726 = vmatpush.msrb.mxu2 %v1816_v42 }
 0x358   :  { %727 = vmatpush.msrb.mxu2 %v1825_v44  ;;  %v768_v44 = vld [vmem:[%s2070_s5 + $0x28] sm:$0xff] }
 0x35a   :  { %728 = vmatpush.msrb.mxu2 %v1834_v47  ;;  %v765_v47 = vld [vmem:[%s2070_s5 + $0x10] sm:$0xff] }
 0x35c   :  { %729 = vmatpush.msrb.mxu2 %v1844_v26 }
 0x35e   :  { %730 = vmatpush.msrb.mxu2 %v1853_v4 }
 0x360   :  { %731 = vmatpush.msrb.mxu2 %v925_v31  ;;  %v795_v31 = vld [vmem:[%s2071_s6] sm:$0xff] }
 0x362   :  { %732 = vmatpush.msrb.mxu2 %v1344_v53  ;;  %v847_v53 = vld [vmem:[%s2067_s0 + $0x38] sm:$0xff] }
 0x363   :  { %v507_v33 = vpop.f32.mrf.mxu3  ;;  %697 = vmatmul.f32.vlgmr.msrb.gmra.mxu0 %v847_v53 }
 0x364   :  { %v508_v1 = vadd.f32 %v507_v33, %v488_v32  ;;  %733 = vmatpush.msrb.mxu2 %v1356_v55  ;;  %v614_v55 = vpop.f32.mrf.mxu0 }
 0x366   :  { %869 = vtanh.f32 %v508_v1  ;;  %734 = vmatpush.msrb.mxu2 %v1368_v57 }
 0x368   :  { %735 = vmatpush.msrb.mxu2 %v1380_v59 }
 0x36a   :  { %736 = vmatpush.msrb.mxu2 %v1390_v61  ;;  %v777_v61 = vld [vmem:[%s2070_s5 + $0x70] sm:$0xff] }
 0x36c   :  { %v870_v35 = vpop.eup %869  ;;  %737 = vmatpush.msrb.mxu2 %v1405_v51  ;;  %v776_v51 = vld [vmem:[%s2070_s5 + $0x68] sm:$0xff] }
 0x36d   :  { %590 = vmatmul.f32.vlgmr.msrb.gmra.mxu3 %v870_v35 }
 0x36e   :  { %742 = vmatpush.msrb.mxu3 %v1882_v10  ;;  %v791_v10 = vld [vmem:[%s2070_s5 + $0xe0] sm:$0xff] }
 0x370   :  { %743 = vmatpush.msrb.mxu3 %v916_v2  ;;  %v789_v2 = vld [vmem:[%s2070_s5 + $0xd0] sm:$0xff] }
 0x372   :  { %744 = vmatpush.msrb.mxu3 %v918_v3  ;;  %v787_v3 = vld [vmem:[%s2070_s5 + $0xc0] sm:$0xff] }
 0x374   :  { %745 = vmatpush.msrb.mxu3 %v919_v13  ;;  %v786_v13 = vld [vmem:[%s2070_s5 + $0xb8] sm:$0xff] }
 0x376   :  { %746 = vmatpush.msrb.mxu3 %v920_v15  ;;  %v785_v15 = vld [vmem:[%s2070_s5 + $0xb0] sm:$0xff] }
 0x378   :  { %747 = vmatpush.msrb.mxu3 %v921_v16  ;;  %v784_v16 = vld [vmem:[%s2070_s5 + $0xa8] sm:$0xff] }
 0x37a   :  { %748 = vmatpush.msrb.mxu3 %v922_v18  ;;  %v783_v18 = vld [vmem:[%s2070_s5 + $0xa0] sm:$0xff] }
 0x37c   :  { %749 = vmatpush.msrb.mxu3 %v923_v19  ;;  %v782_v19 = vld [vmem:[%s2070_s5 + $0x98] sm:$0xff] }
 0x37e   :  { %750 = vmatpush.msrb.mxu3 %v924_v20  ;;  %v781_v20 = vld [vmem:[%s2070_s5 + $0x90] sm:$0xff] }
 0x380   :  { %751 = vmatpush.msrb.mxu3 %v1349_v54  ;;  %v615_v54 = vadd.f32 %v614_v55, %v1453_v50 }
 0x382   :  { %752 = vmatpush.msrb.mxu3 %v1361_v56 }
 0x384   :  { %753 = vmatpush.msrb.mxu3 %v2142_v5  ;;  %v775_v5 = vld [vmem:[%s2070_s5 + $0x60] sm:$0xff] }
 0x386   :  { %754 = vmatpush.msrb.mxu3 %v1385_v60  ;;  %v778_v60 = vld [vmem:[%s2070_s5 + $0x78] sm:$0xff] }
 0x387   :  { %796 = vmatpush.msra.mxu0 %v778_v60 }
 0x388   :  { %755 = vmatpush.msrb.mxu3 %v2143_v7  ;;  %v774_v7 = vld [vmem:[%s2070_s5 + $0x58] sm:$0xff] }
 0x389   :  { %797 = vmatpush.msra.mxu0 %v777_v61 }
 0x38a   :  { %756 = vmatpush.msrb.mxu3 %v2144_v9  ;;  %v773_v9 = vld [vmem:[%s2070_s5 + $0x50] sm:$0xff] }
 0x38b   :  { %798 = vmatpush.msra.mxu0 %v776_v51 }
 0x38c   :  { %757 = vmatpush.msrb.mxu3 %v2145_v11  ;;  %v772_v11 = vld [vmem:[%s2070_s5 + $0x48] sm:$0xff] }
 0x38d   :  { %799 = vmatpush.msra.mxu0 %v775_v5 }
 0x38f   :  { %800 = vmatpush.msra.mxu0 %v774_v7 }
 0x391   :  { %801 = vmatpush.msra.mxu0 %v773_v9 }
 0x393   :  { %802 = vmatpush.msra.mxu0 %v772_v11 }
 0x395   :  { %803 = vmatpush.msra.mxu0 %v771_v36 }
 0x397   :  { %804 = vmatpush.msra.mxu0 %v770_v37 }
 0x399   :  { %805 = vmatpush.msra.mxu0 %v769_v38 }
 0x39b   :  { %806 = vmatpush.msra.mxu0 %v768_v44 }
 0x39d   :  { %807 = vmatpush.msra.mxu0 %v767_v45 }
 0x39f   :  { %808 = vmatpush.msra.mxu0 %v766_v46 }
 0x3a1   :  { %809 = vmatpush.msra.mxu0 %v765_v47 }
 0x3a3   :  { %810 = vmatpush.msra.mxu0 %v764_v49 }
 0x3a5   :  { %811 = vmatpush.msra.mxu0 %v763_v17 }
 0x3ca   :  { %v634_v57 = vpop.f32.mrf.mxu1 }
 0x3cb   :  { %v635_v56 = vadd.f32 %v634_v57, %v615_v54 }
 0x3cd   :  { %871 = vtanh.f32 %v635_v56 }
 0x3d0   :  { %v571_v39 = vpop.f32.mrf.mxu2 }
 0x3d1   :  { %v572_v40 = vadd.f32 %v571_v39, %v1546_v63 }
 0x3d3   :  { %v872_v59 = vpop.eup %871 }
 0x3d4   :  { %654 = vmatmul.f32.vlgmr.msra.gmra.mxu2 %v872_v59  ;;  %717 = vmatmul.f32.vlgmr.msrb.gmra.mxu1 %v872_v59 }
 0x3e0   :  { %v698_v26 = vpop.f32.mrf.mxu0 }
 0x3e1   :  { %v699_v52 = vadd.f32 %v698_v26, %v1453_v50  ;;  %v793_v50 = vld [vmem:[%s2070_s5 + $0xf0] sm:$0xff] }
 0x3e2   :  { %817 = vmatpush.msra.mxu1 %v793_v50 }
 0x3e4   :  { %818 = vmatpush.msra.mxu1 %v792_v8 }
 0x3e6   :  { %819 = vmatpush.msra.mxu1 %v791_v10 }
 0x3e8   :  { %820 = vmatpush.msra.mxu1 %v790_v62 }
 0x3ea   :  { %821 = vmatpush.msra.mxu1 %v789_v2 }
 0x3ec   :  { %822 = vmatpush.msra.mxu1 %v788_v14 }
 0x3ee   :  { %823 = vmatpush.msra.mxu1 %v787_v3 }
 0x3f0   :  { %v591_v41 = vpop.f32.mrf.mxu3  ;;  %824 = vmatpush.msra.mxu1 %v786_v13 }
 0x3f1   :  { %v592_v42 = vadd.f32 %v591_v41, %v572_v40 }
 0x3f2   :  { %825 = vmatpush.msra.mxu1 %v785_v15 }
 0x3f3   :  { %873 = vtanh.f32 %v592_v42 }
 0x3f4   :  { %826 = vmatpush.msra.mxu1 %v784_v16 }
 0x3f6   :  { %827 = vmatpush.msra.mxu1 %v783_v18 }
 0x3f8   :  { %828 = vmatpush.msra.mxu1 %v782_v19 }
 0x3f9   :  { %v874_v43 = vpop.eup %873 }
 0x3fa   :  { %674 = vmatmul.f32.vlgmr.msra.gmra.mxu3 %v874_v43  ;;  %829 = vmatpush.msra.mxu1 %v781_v20 }
 0x3fc   :  { %830 = vmatpush.msra.mxu1 %v780_v21 }
 0x3fe   :  { %831 = vmatpush.msra.mxu1 %v779_v23 }
 0x451   :  { %v718_v34 = vpop.f32.mrf.mxu1 }
 0x452   :  { %v719_v0 = vadd.f32 %v718_v34, %v699_v52 }
 0x454   :  { %875 = vtanh.f32 %v719_v0 }
 0x457   :  { %v655_v22 = vpop.f32.mrf.mxu2 }
 0x458   :  { %v656_v12 = vadd.f32 %v655_v22, %v1546_v63 }
 0x45a   :  { %v876_v4 = vpop.eup %875 }
 0x45b   :  { %738 = vmatmul.f32.vlgmr.msrb.gmra.mxu2 %v876_v4  ;;  %812 = vmatmul.f32.vlgmr.msra.gmra.mxu0 %v876_v4 }
 0x47d   :  { %v675_v30 = vpop.f32.mrf.mxu3 }
 0x47e   :  { %v676_v58 = vadd.f32 %v675_v30, %v656_v12 }
 0x480   :  { %877 = vtanh.f32 %v676_v58 }
 0x486   :  { %v878_v48 = vpop.eup %877 }
 0x487   :  { %758 = vmatmul.f32.vlgmr.msrb.gmra.mxu3 %v878_v48 }
 0x4d8   :  { %v813_v32 = vpop.f32.mrf.mxu0 }
 0x4d9   :  { %v814_v33 = vadd.f32 %v813_v32, %v795_v31 }
 0x4de   :  { %v739_v24 = vpop.f32.mrf.mxu2 }
 0x4df   :  { %v740_v25 = vadd.f32 %v739_v24, %v1546_v63 }
 0x50a   :  { %v759_v27 = vpop.f32.mrf.mxu3 }
 0x50b   :  { %v760_v28 = vadd.f32 %v759_v27, %v740_v25 }
 0x50d   :  { %879 = vtanh.f32 %v760_v28 }
 0x513   :  { %v880_v29 = vpop.eup %879 }
 0x514   :  { %832 = vmatmul.f32.vlgmr.msra.gmra.mxu1 %v880_v29 }
 0x591   :  { %v833_v1 = vpop.f32.mrf.mxu1 }
 0x592   :  { %v834_v35 = vadd.f32 %v833_v1, %v814_v33 }
 0x594   :  { %836 = vst [vmem:[%s2072_s7] sm:$0xff] %v834_v35 }

</bundles_post_ra>
